<compile_context>
chip_gen: v6e
topology: v6e:2x2x1
jax: 0.10.0
libtpu: 0.0.40
codegen_flags: <defaults>
</compile_context>

<pallas_src>
import functools

import jax
import jax.numpy as jnp
from jax import lax
from jax.experimental import pallas as pl
from jax.experimental.pallas import tpu as pltpu


def _round_up(x, m):
    return (x + m - 1) // m * m


# ---------------------------------------------------------------------------
# LSTM stack kernel (no grid -> single-buffered full-array VMEM operands)
# ---------------------------------------------------------------------------
def lstm_stack_kernel(emb_ref, wih_ref, whh_ref, b_ref, h0_ref, c0_ref,
                      y_ref, hn_ref, cn_ref, gbuf_ref):
    # emb_ref : (S*Bp, F)      time-major embedded tokens, batch padded to Bp (f32)
    # wih_ref : (L, F, 4F)     fused input->gate weights, x @ W form (mm dtype)
    # whh_ref : (L, F, 4F)     fused hidden->gate weights (f32, stays on serial path)
    # b_ref   : (L, 1, 4F)     b_ih + b_hh
    # h0/c0   : (L, Bp, F)     initial state (f32)
    # y_ref   : (S*Bp, F)      final-layer hidden states, also inter-layer buffer
    # hn/cn   : (L, Bp, F)     final state
    # gbuf_ref: (Tc*Bp, 4F)    per-chunk hoisted input projection scratch (f32)
    L, Bp, F = h0_ref.shape
    M = emb_ref.shape[0]
    S = M // Bp
    Tc = gbuf_ref.shape[0] // Bp          # timesteps per projection chunk
    NC = -(-S // Tc)                      # number of chunks (static)
    mm_dtype = wih_ref.dtype

    for layer in range(L):                # static layer loop
        wh = whh_ref[layer]               # (F, 4F) f32 recurrence weight
        bias_l = b_ref[layer]             # (1, 4F)
        h = h0_ref[layer]                 # (Bp, F)
        c = c0_ref[layer]

        for ci in range(NC):              # static chunk loop over time
            t0 = ci * Tc
            Sc = min(Tc, S - t0)          # timesteps in this chunk (static)
            rows0 = t0 * Bp
            nrows = Sc * Bp

            # ---- hoisted input projection for the whole chunk (one MXU matmul) ----
            # layer > 0 reads y_ref rows written by the previous layer; this layer's
            # recurrence overwrites those rows only after the projection read.
            src = emb_ref if layer == 0 else y_ref
            xin = src[pl.ds(rows0, nrows), :].astype(mm_dtype)          # (nrows, F)
            gbuf_ref[pl.ds(0, nrows), :] = (
                jnp.dot(xin, wih_ref[layer],
                        preferred_element_type=jnp.float32) + bias_l)   # (nrows, 4F)

            # ---- serial recurrence: only h @ W_hh + elementwise on the crit path ----
            unroll = True if Sc <= 16 else (4 if F < 512 else 2)

            def step(t, carry, _rows0=rows0):
                h, c = carry                                            # (Bp, F) each
                row = pl.multiple_of(t * Bp, Bp)
                g = gbuf_ref[pl.ds(row, Bp), :] + jnp.dot(
                    h, wh, preferred_element_type=jnp.float32)          # (Bp, 4F)
                i_g = jax.nn.sigmoid(g[:, 0 * F:1 * F])
                f_g = jax.nn.sigmoid(g[:, 1 * F:2 * F])
                g_g = jnp.tanh(g[:, 2 * F:3 * F])
                o_g = jax.nn.sigmoid(g[:, 3 * F:4 * F])
                c_new = f_g * c + i_g * g_g
                h_new = o_g * jnp.tanh(c_new)
                grow = pl.multiple_of(t * Bp + _rows0, Bp)
                y_ref[pl.ds(grow, Bp), :] = h_new
                return (h_new, c_new)

            h, c = lax.fori_loop(0, Sc, step, (h, c), unroll=unroll)

        hn_ref[layer] = h
        cn_ref[layer] = c


def lstm_stack_pallas(emb2d, wih, whh, bias, h0, c0, time_chunk=256):
    M, F = emb2d.shape
    L, Bp, _ = h0.shape
    G = 4 * F
    S = M // Bp
    Tc = min(time_chunk, S)

    def vmem_full():
        return pl.BlockSpec(memory_space=pltpu.MemorySpace.VMEM)

    return pl.pallas_call(
        lstm_stack_kernel,
        out_shape=(jax.ShapeDtypeStruct((M, F), jnp.float32),      # y (final layer outputs)
                   jax.ShapeDtypeStruct((L, Bp, F), jnp.float32),  # h_n
                   jax.ShapeDtypeStruct((L, Bp, F), jnp.float32)), # c_n
        in_specs=[vmem_full() for _ in range(6)],
        out_specs=(vmem_full(), vmem_full(), vmem_full()),
        scratch_shapes=[pltpu.VMEM((Tc * Bp, G), jnp.float32)],
    )(emb2d, wih, whh, bias, h0, c0)


# ---------------------------------------------------------------------------
# Tied decoder: (S*Bp, F) @ (F, Vp); vocab axis outer so the weight tile stays
# resident while the (smaller) activation axis sweeps inside.
# ---------------------------------------------------------------------------
def decoder_kernel(y_ref, w_ref, out_ref):
    out_ref[...] = jnp.dot(y_ref[...], w_ref[...],
                           preferred_element_type=jnp.float32)


def decoder_pallas(y, w, tn):
    M, F = y.shape
    Vp = w.shape[1]
    item = jnp.dtype(y.dtype).itemsize

    tm = min(512, M)                      # M is a multiple of 8 (batch padded)

    def est_bytes(tm_, tn_):
        # double-buffered inputs + double-buffered f32 output tile
        return 2 * (tm_ * F + F * tn_) * item + 2 * tm_ * tn_ * 4

    # keep tiles under ~14 MiB so even the v5e 16 MiB scoped default is safe
    while est_bytes(tm, tn) > 14 * 1024 * 1024 and (tn > 128 or tm > 8):
        if tn > 128:
            tn //= 2
        else:
            tm = max(8, (tm // 2) // 8 * 8)

    Mp = pl.cdiv(M, tm) * tm
    if Mp != M:
        y = jnp.pad(y, ((0, Mp - M), (0, 0)))

    grid = (Vp // tn, Mp // tm)           # vocab outer, M inner -> weight streamed once
    out = pl.pallas_call(
        decoder_kernel,
        out_shape=jax.ShapeDtypeStruct((Mp, Vp), jnp.float32),
        grid_spec=pltpu.PrefetchScalarGridSpec(
            num_scalar_prefetch=0,
            grid=grid,
            in_specs=[pl.BlockSpec((tm, F), lambda v, m: (m, 0)),
                      pl.BlockSpec((F, tn), lambda v, m: (0, v))],
            out_specs=pl.BlockSpec((tm, tn), lambda v, m: (m, v))),
        compiler_params=pltpu.CompilerParams(
            dimension_semantics=("parallel", "parallel")),
    )(y, w)
    return out[:M]


# ---------------------------------------------------------------------------
# Parameter prep (done once, not per forward call)
# ---------------------------------------------------------------------------
def prepare_params(emb_w, w_ih, w_hh, b_ih, b_hh, matmul_dtype=jnp.bfloat16):
    V, F = emb_w.shape
    L = w_ih.shape[0]
    Vp = _round_up(V, 128)
    tn = min(512, Vp)                     # 256-multiple for v6e/v7x MXU when large
    Vp = _round_up(Vp, tn)
    # tied decoder weight (decoder.bias is zeroed in the torch module -> bias-free)
    dec_w = jnp.pad(emb_w.T.astype(jnp.float32),
                    ((0, 0), (0, Vp - V))).astype(matmul_dtype)
    return dict(
        emb_w=emb_w.astype(jnp.float32),
        wih=jnp.transpose(w_ih, (0, 2, 1)).astype(matmul_dtype),   # (L, F, 4F)
        whh=jnp.transpose(w_hh, (0, 2, 1)).astype(jnp.float32),    # (L, F, 4F)
        bias=(b_ih + b_hh).reshape(L, 1, 4 * F).astype(jnp.float32),
        dec_w=dec_w,
        vocab_size=V, feature_size=F, n_layer=L,
        dec_tn=tn, matmul_dtype=matmul_dtype,
    )


# ---------------------------------------------------------------------------
# Forward wrapper (matches ScriptGenModelNLayer.forward)
# ---------------------------------------------------------------------------
def script_gen_forward(tokens, params, hidden_state=None, time_chunk=256):
    """Returns (logits (B,S,V), (h_n (L,B,F), c_n (L,B,F)))."""
    B, S = tokens.shape
    V = params["vocab_size"]
    F = params["feature_size"]
    L = params["n_layer"]
    mm_dtype = params["matmul_dtype"]
    Bp = _round_up(B, 8)                  # sublane-aligned batch

    if hidden_state is None:
        h0 = jnp.zeros((L, Bp, F), jnp.float32)
        c0 = jnp.zeros((L, Bp, F), jnp.float32)
    else:
        h0, c0 = hidden_state
        h0 = jnp.pad(h0.astype(jnp.float32), ((0, 0), (0, Bp - B), (0, 0)))
        c0 = jnp.pad(c0.astype(jnp.float32), ((0, 0), (0, Bp - B), (0, 0)))

    # fused embedding gather directly into the time-major, batch-padded layout:
    # only the tiny int token array is transposed/padded, one gather materializes
    # the activations once in the kernel's (S*Bp, F) layout.
    tok_tm = jnp.pad(jnp.transpose(tokens, (1, 0)), ((0, 0), (0, Bp - B)))  # (S, Bp)
    emb2d = jnp.take(params["emb_w"], tok_tm.reshape(-1), axis=0)           # (S*Bp, F)

    y2d, h_n, c_n = lstm_stack_pallas(emb2d, params["wih"], params["whh"],
                                      params["bias"], h0, c0, time_chunk)

    logits2d = decoder_pallas(y2d.astype(mm_dtype), params["dec_w"],
                              params["dec_tn"])                             # (S*Bp, Vp)
    logits = logits2d[:S * Bp, :V].reshape(S, Bp, V)[:, :B, :]
    logits = jnp.transpose(logits, (1, 0, 2))                               # (B, S, V)
    return logits, (h_n[:, :B, :], c_n[:, :B, :])


# ---------------------------------------------------------------------------
# Pure-JAX reference (torch.nn.LSTM semantics, gate order i,f,g,o)
# ---------------------------------------------------------------------------
def reference_forward(tokens, emb_w, w_ih, w_hh, b_ih, b_hh, h0, c0):
    B, S = tokens.shape
    V, F = emb_w.shape
    L = w_ih.shape[0]
    layer_in = jnp.take(emb_w, tokens, axis=0)  # (B, S, F)
    h = [h0[l] for l in range(L)]
    c = [c0[l] for l in range(L)]
    for l in range(L):
        outs = []
        for t in range(S):
            xt = layer_in[:, t, :]
            gates = xt @ w_ih[l].T + b_ih[l] + h[l] @ w_hh[l].T + b_hh[l]
            i = jax.nn.sigmoid(gates[:, 0:F])
            f = jax.nn.sigmoid(gates[:, F:2 * F])
            g = jnp.tanh(gates[:, 2 * F:3 * F])
            o = jax.nn.sigmoid(gates[:, 3 * F:4 * F])
            c[l] = f * c[l] + i * g
            h[l] = o * jnp.tanh(c[l])
            outs.append(h[l])
        layer_in = jnp.stack(outs, axis=1)
    logits = layer_in @ emb_w.T
    return logits, jnp.stack(h), jnp.stack(c)


if __name__ == "__main__":
    vocab_size, feature_size, n_layer = 32, 32, 2
    batch, seq = 2, 8

    key = jax.random.PRNGKey(0)
    k1, k2, k3, k4, k5, k6 = jax.random.split(key, 6)
    bound = float(1.0 / (feature_size ** 0.5))

    # deterministic synthetic parameters (PyTorch-style init)
    emb_w = jax.random.normal(k1, (vocab_size, feature_size), jnp.float32)   # nn.Embedding
    w_ih = jax.random.uniform(k2, (n_layer, 4 * feature_size, feature_size),
                              jnp.float32, -bound, bound)
    w_hh = jax.random.uniform(k3, (n_layer, 4 * feature_size, feature_size),
                              jnp.float32, -bound, bound)
    b_ih = jax.random.uniform(k4, (n_layer, 4 * feature_size), jnp.float32, -bound, bound)
    b_hh = jax.random.uniform(k5, (n_layer, 4 * feature_size), jnp.float32, -bound, bound)
    tokens = jax.random.randint(k6, (batch, seq), 0, vocab_size)

    ref_logits, ref_h, ref_c = reference_forward(
        tokens, emb_w, w_ih, w_hh, b_ih, b_hh,
        jnp.zeros((n_layer, batch, feature_size)),
        jnp.zeros((n_layer, batch, feature_size)))

    # ---- tight parity check with f32 matmul operands ----
    params_f32 = prepare_params(emb_w, w_ih, w_hh, b_ih, b_hh,
                                matmul_dtype=jnp.float32)
    logits, (h_n, c_n) = script_gen_forward(tokens, params_f32, hidden_state=None)
    jax.block_until_ready((logits, h_n, c_n))
    assert logits.shape == (batch, seq, vocab_size)
    assert h_n.shape == (n_layer, batch, feature_size)
    assert c_n.shape == (n_layer, batch, feature_size)
    assert float(jnp.max(jnp.abs(logits - ref_logits))) < 1e-3
    assert float(jnp.max(jnp.abs(h_n - ref_h))) < 1e-3
    assert float(jnp.max(jnp.abs(c_n - ref_c))) < 1e-3

    # ---- performance path: bf16 operands / f32 accumulation (v6e/v7x MXU) ----
    params_bf16 = prepare_params(emb_w, w_ih, w_hh, b_ih, b_hh,
                                 matmul_dtype=jnp.bfloat16)
    logits_b, (h_b, c_b) = script_gen_forward(tokens, params_bf16, hidden_state=None)
    jax.block_until_ready((logits_b, h_b, c_b))
    assert logits_b.shape == (batch, seq, vocab_size)
    assert float(jnp.max(jnp.abs(logits_b - ref_logits))) < 1e-1
    assert float(jnp.max(jnp.abs(h_b - ref_h))) < 5e-2
    assert float(jnp.max(jnp.abs(c_b - ref_c))) < 5e-2

    print("KERNEL_OK")
</pallas_src>

<mosaic_0001>
module attributes {stable_mosaic.version = 11 : i64} {
  func.func @lstm_stack_kernel(%arg0: memref<64x32xf32, #tpu.memory_space<vmem>>, %arg1: memref<2x32x128xf32, #tpu.memory_space<vmem>>, %arg2: memref<2x32x128xf32, #tpu.memory_space<vmem>>, %arg3: memref<2x1x128xf32, #tpu.memory_space<vmem>>, %arg4: memref<2x8x32xf32, #tpu.memory_space<vmem>>, %arg5: memref<2x8x32xf32, #tpu.memory_space<vmem>>, %arg6: memref<64x32xf32, #tpu.memory_space<vmem>>, %arg7: memref<2x8x32xf32, #tpu.memory_space<vmem>>, %arg8: memref<2x8x32xf32, #tpu.memory_space<vmem>>, %arg9: memref<64x128xf32, #tpu.memory_space<vmem>>) attributes {dimension_semantics = [], scalar_prefetch = 0 : i64, scratch_operands = 1 : i64, tpu.core_type = #tpu.core_type<tc>} {
    %c0 = arith.constant 0 : index
    %c0_0 = arith.constant 0 : index
    %c0_1 = arith.constant 0 : index
    %0 = vector.load %arg2[%c0, %c0_0, %c0_1] : memref<2x32x128xf32, #tpu.memory_space<vmem>>, vector<1x32x128xf32>
    %1 = vector.shape_cast %0 : vector<1x32x128xf32> to vector<32x128xf32>
    %c0_2 = arith.constant 0 : index
    %c0_3 = arith.constant 0 : index
    %c0_4 = arith.constant 0 : index
    %2 = vector.load %arg3[%c0_2, %c0_3, %c0_4] : memref<2x1x128xf32, #tpu.memory_space<vmem>>, vector<1x1x128xf32>
    %3 = vector.shape_cast %2 : vector<1x1x128xf32> to vector<1x128xf32>
    %c0_5 = arith.constant 0 : index
    %c0_6 = arith.constant 0 : index
    %c0_7 = arith.constant 0 : index
    %4 = vector.load %arg4[%c0_5, %c0_6, %c0_7] : memref<2x8x32xf32, #tpu.memory_space<vmem>>, vector<1x8x32xf32>
    %5 = vector.shape_cast %4 : vector<1x8x32xf32> to vector<8x32xf32>
    %c0_8 = arith.constant 0 : index
    %c0_9 = arith.constant 0 : index
    %c0_10 = arith.constant 0 : index
    %6 = vector.load %arg5[%c0_8, %c0_9, %c0_10] : memref<2x8x32xf32, #tpu.memory_space<vmem>>, vector<1x8x32xf32>
    %7 = vector.shape_cast %6 : vector<1x8x32xf32> to vector<8x32xf32>
    %c0_11 = arith.constant 0 : index
    %c0_12 = arith.constant 0 : index
    %8 = vector.load %arg0[%c0_11, %c0_12] : memref<64x32xf32, #tpu.memory_space<vmem>>, vector<64x32xf32>
    %c0_13 = arith.constant 0 : index
    %c0_14 = arith.constant 0 : index
    %c0_15 = arith.constant 0 : index
    %9 = vector.load %arg1[%c0_13, %c0_14, %c0_15] : memref<2x32x128xf32, #tpu.memory_space<vmem>>, vector<1x32x128xf32>
    %10 = vector.shape_cast %9 : vector<1x32x128xf32> to vector<32x128xf32>
    %cst = arith.constant dense<0.000000e+00> : vector<64x128xf32>
    %11 = tpu.matmul %8, %10, %cst {dimension_numbers = #tpu.dot_dimension_numbers<[1], [0], [0], [1], [0, 0, 1, 1], [], []>} : vector<64x32xf32>, vector<32x128xf32>, vector<64x128xf32> -> vector<64x128xf32>
    %12 = vector.broadcast %3 : vector<1x128xf32> to vector<64x128xf32>
    %13 = arith.addf %11, %12 : vector<64x128xf32>
    %c0_16 = arith.constant 0 : index
    %c0_17 = arith.constant 0 : index
    %14 = vector.load %arg9[%c0_16, %c0_17] : memref<64x128xf32, #tpu.memory_space<vmem>>, vector<64x128xf32>
    tpu.vector_store %arg9[%c0_16, %c0_17], %13 {strides = array<i32>} : memref<64x128xf32, #tpu.memory_space<vmem>>, vector<64x128xf32>,
    %c0_i32 = arith.constant 0 : i32
    %c8_i32 = arith.constant 8 : i32
    %15 = arith.muli %c0_i32, %c8_i32 : i32
    %16 = tpu.assume_multiple %15, 8 : i32
    %17 = arith.index_cast %16 : i32 to index
    %c0_18 = arith.constant 0 : index
    %18 = vector.load %arg9[%17, %c0_18] : memref<64x128xf32, #tpu.memory_space<vmem>>, vector<8x128xf32>
    %cst_19 = arith.constant dense<0.000000e+00> : vector<8x128xf32>
    %19 = tpu.matmul %5, %1, %cst_19 {dimension_numbers = #tpu.dot_dimension_numbers<[1], [0], [0], [1], [0, 0, 1, 1], [], []>} : vector<8x32xf32>, vector<32x128xf32>, vector<8x128xf32> -> vector<8x128xf32>
    %20 = arith.addf %18, %19 : vector<8x128xf32>
    %21 = vector.extract_strided_slice %20 {offsets = [0, 0], sizes = [8, 32], strides = [1, 1]} : vector<8x128xf32> to vector<8x32xf32>
    %22 = arith.negf %21 : vector<8x32xf32>
    %23 = math.exp %22 : vector<8x32xf32>
    %cst_20 = arith.constant 1.000000e+00 : f32
    %24 = vector.broadcast %cst_20 : f32 to vector<8x32xf32>
    %25 = arith.addf %24, %23 : vector<8x32xf32>
    %26 = arith.divf %24, %25 : vector<8x32xf32>
    %27 = vector.extract_strided_slice %20 {offsets = [0, 32], sizes = [8, 32], strides = [1, 1]} : vector<8x128xf32> to vector<8x32xf32>
    %28 = arith.negf %27 : vector<8x32xf32>
    %29 = math.exp %28 : vector<8x32xf32>
    %cst_21 = arith.constant 1.000000e+00 : f32
    %30 = vector.broadcast %cst_21 : f32 to vector<8x32xf32>
    %31 = arith.addf %30, %29 : vector<8x32xf32>
    %32 = arith.divf %30, %31 : vector<8x32xf32>
    %33 = vector.extract_strided_slice %20 {offsets = [0, 64], sizes = [8, 32], strides = [1, 1]} : vector<8x128xf32> to vector<8x32xf32>
    %34 = math.tanh %33 : vector<8x32xf32>
    %35 = vector.extract_strided_slice %20 {offsets = [0, 96], sizes = [8, 32], strides = [1, 1]} : vector<8x128xf32> to vector<8x32xf32>
    %36 = arith.negf %35 : vector<8x32xf32>
    %37 = math.exp %36 : vector<8x32xf32>
    %cst_22 = arith.constant 1.000000e+00 : f32
    %38 = vector.broadcast %cst_22 : f32 to vector<8x32xf32>
    %39 = arith.addf %38, %37 : vector<8x32xf32>
    %40 = arith.divf %38, %39 : vector<8x32xf32>
    %41 = arith.mulf %32, %7 : vector<8x32xf32>
    %42 = arith.mulf %26, %34 : vector<8x32xf32>
    %43 = arith.addf %41, %42 : vector<8x32xf32>
    %44 = math.tanh %43 : vector<8x32xf32>
    %45 = arith.mulf %40, %44 : vector<8x32xf32>
    %c8_i32_23 = arith.constant 8 : i32
    %46 = arith.muli %c0_i32, %c8_i32_23 : i32
    %c0_i32_24 = arith.constant 0 : i32
    %47 = arith.addi %46, %c0_i32_24 : i32
    %48 = tpu.assume_multiple %47, 8 : i32
    %49 = arith.index_cast %48 : i32 to index
    %c0_25 = arith.constant 0 : index
    %50 = vector.load %arg6[%49, %c0_25] : memref<64x32xf32, #tpu.memory_space<vmem>>, vector<8x32xf32>
    tpu.vector_store %arg6[%49, %c0_25], %45 {strides = array<i32>} : memref<64x32xf32, #tpu.memory_space<vmem>>, vector<8x32xf32>,
    %c1_i32 = arith.constant 1 : i32
    %c8_i32_26 = arith.constant 8 : i32
    %51 = arith.muli %c1_i32, %c8_i32_26 : i32
    %52 = tpu.assume_multiple %51, 8 : i32
    %53 = arith.index_cast %52 : i32 to index
    %c0_27 = arith.constant 0 : index
    %54 = vector.load %arg9[%53, %c0_27] : memref<64x128xf32, #tpu.memory_space<vmem>>, vector<8x128xf32>
    %cst_28 = arith.constant dense<0.000000e+00> : vector<8x128xf32>
    %55 = tpu.matmul %45, %1, %cst_28 {dimension_numbers = #tpu.dot_dimension_numbers<[1], [0], [0], [1], [0, 0, 1, 1], [], []>} : vector<8x32xf32>, vector<32x128xf32>, vector<8x128xf32> -> vector<8x128xf32>
    %56 = arith.addf %54, %55 : vector<8x128xf32>
    %57 = vector.extract_strided_slice %56 {offsets = [0, 0], sizes = [8, 32], strides = [1, 1]} : vector<8x128xf32> to vector<8x32xf32>
    %58 = arith.negf %57 : vector<8x32xf32>
    %59 = math.exp %58 : vector<8x32xf32>
    %cst_29 = arith.constant 1.000000e+00 : f32
    %60 = vector.broadcast %cst_29 : f32 to vector<8x32xf32>
    %61 = arith.addf %60, %59 : vector<8x32xf32>
    %62 = arith.divf %60, %61 : vector<8x32xf32>
    %63 = vector.extract_strided_slice %56 {offsets = [0, 32], sizes = [8, 32], strides = [1, 1]} : vector<8x128xf32> to vector<8x32xf32>
    %64 = arith.negf %63 : vector<8x32xf32>
    %65 = math.exp %64 : vector<8x32xf32>
    %cst_30 = arith.constant 1.000000e+00 : f32
    %66 = vector.broadcast %cst_30 : f32 to vector<8x32xf32>
    %67 = arith.addf %66, %65 : vector<8x32xf32>
    %68 = arith.divf %66, %67 : vector<8x32xf32>
    %69 = vector.extract_strided_slice %56 {offsets = [0, 64], sizes = [8, 32], strides = [1, 1]} : vector<8x128xf32> to vector<8x32xf32>
    %70 = math.tanh %69 : vector<8x32xf32>
    %71 = vector.extract_strided_slice %56 {offsets = [0, 96], sizes = [8, 32], strides = [1, 1]} : vector<8x128xf32> to vector<8x32xf32>
    %72 = arith.negf %71 : vector<8x32xf32>
    %73 = math.exp %72 : vector<8x32xf32>
    %cst_31 = arith.constant 1.000000e+00 : f32
    %74 = vector.broadcast %cst_31 : f32 to vector<8x32xf32>
    %75 = arith.addf %74, %73 : vector<8x32xf32>
    %76 = arith.divf %74, %75 : vector<8x32xf32>
    %77 = arith.mulf %68, %43 : vector<8x32xf32>
    %78 = arith.mulf %62, %70 : vector<8x32xf32>
    %79 = arith.addf %77, %78 : vector<8x32xf32>
    %80 = math.tanh %79 : vector<8x32xf32>
    %81 = arith.mulf %76, %80 : vector<8x32xf32>
    %c8_i32_32 = arith.constant 8 : i32
    %82 = arith.muli %c1_i32, %c8_i32_32 : i32
    %c0_i32_33 = arith.constant 0 : i32
    %83 = arith.addi %82, %c0_i32_33 : i32
    %84 = tpu.assume_multiple %83, 8 : i32
    %85 = arith.index_cast %84 : i32 to index
    %c0_34 = arith.constant 0 : index
    %86 = vector.load %arg6[%85, %c0_34] : memref<64x32xf32, #tpu.memory_space<vmem>>, vector<8x32xf32>
    tpu.vector_store %arg6[%85, %c0_34], %81 {strides = array<i32>} : memref<64x32xf32, #tpu.memory_space<vmem>>, vector<8x32xf32>,
    %c2_i32 = arith.constant 2 : i32
    %c8_i32_35 = arith.constant 8 : i32
    %87 = arith.muli %c2_i32, %c8_i32_35 : i32
    %88 = tpu.assume_multiple %87, 8 : i32
    %89 = arith.index_cast %88 : i32 to index
    %c0_36 = arith.constant 0 : index
    %90 = vector.load %arg9[%89, %c0_36] : memref<64x128xf32, #tpu.memory_space<vmem>>, vector<8x128xf32>
    %cst_37 = arith.constant dense<0.000000e+00> : vector<8x128xf32>
    %91 = tpu.matmul %81, %1, %cst_37 {dimension_numbers = #tpu.dot_dimension_numbers<[1], [0], [0], [1], [0, 0, 1, 1], [], []>} : vector<8x32xf32>, vector<32x128xf32>, vector<8x128xf32> -> vector<8x128xf32>
    %92 = arith.addf %90, %91 : vector<8x128xf32>
    %93 = vector.extract_strided_slice %92 {offsets = [0, 0], sizes = [8, 32], strides = [1, 1]} : vector<8x128xf32> to vector<8x32xf32>
    %94 = arith.negf %93 : vector<8x32xf32>
    %95 = math.exp %94 : vector<8x32xf32>
    %cst_38 = arith.constant 1.000000e+00 : f32
    %96 = vector.broadcast %cst_38 : f32 to vector<8x32xf32>
    %97 = arith.addf %96, %95 : vector<8x32xf32>
    %98 = arith.divf %96, %97 : vector<8x32xf32>
    %99 = vector.extract_strided_slice %92 {offsets = [0, 32], sizes = [8, 32], strides = [1, 1]} : vector<8x128xf32> to vector<8x32xf32>
    %100 = arith.negf %99 : vector<8x32xf32>
    %101 = math.exp %100 : vector<8x32xf32>
    %cst_39 = arith.constant 1.000000e+00 : f32
    %102 = vector.broadcast %cst_39 : f32 to vector<8x32xf32>
    %103 = arith.addf %102, %101 : vector<8x32xf32>
    %104 = arith.divf %102, %103 : vector<8x32xf32>
    %105 = vector.extract_strided_slice %92 {offsets = [0, 64], sizes = [8, 32], strides = [1, 1]} : vector<8x128xf32> to vector<8x32xf32>
    %106 = math.tanh %105 : vector<8x32xf32>
    %107 = vector.extract_strided_slice %92 {offsets = [0, 96], sizes = [8, 32], strides = [1, 1]} : vector<8x128xf32> to vector<8x32xf32>
    %108 = arith.negf %107 : vector<8x32xf32>
    %109 = math.exp %108 : vector<8x32xf32>
    %cst_40 = arith.constant 1.000000e+00 : f32
    %110 = vector.broadcast %cst_40 : f32 to vector<8x32xf32>
    %111 = arith.addf %110, %109 : vector<8x32xf32>
    %112 = arith.divf %110, %111 : vector<8x32xf32>
    %113 = arith.mulf %104, %79 : vector<8x32xf32>
    %114 = arith.mulf %98, %106 : vector<8x32xf32>
    %115 = arith.addf %113, %114 : vector<8x32xf32>
    %116 = math.tanh %115 : vector<8x32xf32>
    %117 = arith.mulf %112, %116 : vector<8x32xf32>
    %c8_i32_41 = arith.constant 8 : i32
    %118 = arith.muli %c2_i32, %c8_i32_41 : i32
    %c0_i32_42 = arith.constant 0 : i32
    %119 = arith.addi %118, %c0_i32_42 : i32
    %120 = tpu.assume_multiple %119, 8 : i32
    %121 = arith.index_cast %120 : i32 to index
    %c0_43 = arith.constant 0 : index
    %122 = vector.load %arg6[%121, %c0_43] : memref<64x32xf32, #tpu.memory_space<vmem>>, vector<8x32xf32>
    tpu.vector_store %arg6[%121, %c0_43], %117 {strides = array<i32>} : memref<64x32xf32, #tpu.memory_space<vmem>>, vector<8x32xf32>,
    %c3_i32 = arith.constant 3 : i32
    %c8_i32_44 = arith.constant 8 : i32
    %123 = arith.muli %c3_i32, %c8_i32_44 : i32
    %124 = tpu.assume_multiple %123, 8 : i32
    %125 = arith.index_cast %124 : i32 to index
    %c0_45 = arith.constant 0 : index
    %126 = vector.load %arg9[%125, %c0_45] : memref<64x128xf32, #tpu.memory_space<vmem>>, vector<8x128xf32>
    %cst_46 = arith.constant dense<0.000000e+00> : vector<8x128xf32>
    %127 = tpu.matmul %117, %1, %cst_46 {dimension_numbers = #tpu.dot_dimension_numbers<[1], [0], [0], [1], [0, 0, 1, 1], [], []>} : vector<8x32xf32>, vector<32x128xf32>, vector<8x128xf32> -> vector<8x128xf32>
    %128 = arith.addf %126, %127 : vector<8x128xf32>
    %129 = vector.extract_strided_slice %128 {offsets = [0, 0], sizes = [8, 32], strides = [1, 1]} : vector<8x128xf32> to vector<8x32xf32>
    %130 = arith.negf %129 : vector<8x32xf32>
    %131 = math.exp %130 : vector<8x32xf32>
    %cst_47 = arith.constant 1.000000e+00 : f32
    %132 = vector.broadcast %cst_47 : f32 to vector<8x32xf32>
    %133 = arith.addf %132, %131 : vector<8x32xf32>
    %134 = arith.divf %132, %133 : vector<8x32xf32>
    %135 = vector.extract_strided_slice %128 {offsets = [0, 32], sizes = [8, 32], strides = [1, 1]} : vector<8x128xf32> to vector<8x32xf32>
    %136 = arith.negf %135 : vector<8x32xf32>
    %137 = math.exp %136 : vector<8x32xf32>
    %cst_48 = arith.constant 1.000000e+00 : f32
    %138 = vector.broadcast %cst_48 : f32 to vector<8x32xf32>
    %139 = arith.addf %138, %137 : vector<8x32xf32>
    %140 = arith.divf %138, %139 : vector<8x32xf32>
    %141 = vector.extract_strided_slice %128 {offsets = [0, 64], sizes = [8, 32], strides = [1, 1]} : vector<8x128xf32> to vector<8x32xf32>
    %142 = math.tanh %141 : vector<8x32xf32>
    %143 = vector.extract_strided_slice %128 {offsets = [0, 96], sizes = [8, 32], strides = [1, 1]} : vector<8x128xf32> to vector<8x32xf32>
    %144 = arith.negf %143 : vector<8x32xf32>
    %145 = math.exp %144 : vector<8x32xf32>
    %cst_49 = arith.constant 1.000000e+00 : f32
    %146 = vector.broadcast %cst_49 : f32 to vector<8x32xf32>
    %147 = arith.addf %146, %145 : vector<8x32xf32>
    %148 = arith.divf %146, %147 : vector<8x32xf32>
    %149 = arith.mulf %140, %115 : vector<8x32xf32>
    %150 = arith.mulf %134, %142 : vector<8x32xf32>
    %151 = arith.addf %149, %150 : vector<8x32xf32>
    %152 = math.tanh %151 : vector<8x32xf32>
    %153 = arith.mulf %148, %152 : vector<8x32xf32>
    %c8_i32_50 = arith.constant 8 : i32
    %154 = arith.muli %c3_i32, %c8_i32_50 : i32
    %c0_i32_51 = arith.constant 0 : i32
    %155 = arith.addi %154, %c0_i32_51 : i32
    %156 = tpu.assume_multiple %155, 8 : i32
    %157 = arith.index_cast %156 : i32 to index
    %c0_52 = arith.constant 0 : index
    %158 = vector.load %arg6[%157, %c0_52] : memref<64x32xf32, #tpu.memory_space<vmem>>, vector<8x32xf32>
    tpu.vector_store %arg6[%157, %c0_52], %153 {strides = array<i32>} : memref<64x32xf32, #tpu.memory_space<vmem>>, vector<8x32xf32>,
    %c4_i32 = arith.constant 4 : i32
    %c8_i32_53 = arith.constant 8 : i32
    %159 = arith.muli %c4_i32, %c8_i32_53 : i32
    %160 = tpu.assume_multiple %159, 8 : i32
    %161 = arith.index_cast %160 : i32 to index
    %c0_54 = arith.constant 0 : index
    %162 = vector.load %arg9[%161, %c0_54] : memref<64x128xf32, #tpu.memory_space<vmem>>, vector<8x128xf32>
    %cst_55 = arith.constant dense<0.000000e+00> : vector<8x128xf32>
    %163 = tpu.matmul %153, %1, %cst_55 {dimension_numbers = #tpu.dot_dimension_numbers<[1], [0], [0], [1], [0, 0, 1, 1], [], []>} : vector<8x32xf32>, vector<32x128xf32>, vector<8x128xf32> -> vector<8x128xf32>
    %164 = arith.addf %162, %163 : vector<8x128xf32>
    %165 = vector.extract_strided_slice %164 {offsets = [0, 0], sizes = [8, 32], strides = [1, 1]} : vector<8x128xf32> to vector<8x32xf32>
    %166 = arith.negf %165 : vector<8x32xf32>
    %167 = math.exp %166 : vector<8x32xf32>
    %cst_56 = arith.constant 1.000000e+00 : f32
    %168 = vector.broadcast %cst_56 : f32 to vector<8x32xf32>
    %169 = arith.addf %168, %167 : vector<8x32xf32>
    %170 = arith.divf %168, %169 : vector<8x32xf32>
    %171 = vector.extract_strided_slice %164 {offsets = [0, 32], sizes = [8, 32], strides = [1, 1]} : vector<8x128xf32> to vector<8x32xf32>
    %172 = arith.negf %171 : vector<8x32xf32>
    %173 = math.exp %172 : vector<8x32xf32>
    %cst_57 = arith.constant 1.000000e+00 : f32
    %174 = vector.broadcast %cst_57 : f32 to vector<8x32xf32>
    %175 = arith.addf %174, %173 : vector<8x32xf32>
    %176 = arith.divf %174, %175 : vector<8x32xf32>
    %177 = vector.extract_strided_slice %164 {offsets = [0, 64], sizes = [8, 32], strides = [1, 1]} : vector<8x128xf32> to vector<8x32xf32>
    %178 = math.tanh %177 : vector<8x32xf32>
    %179 = vector.extract_strided_slice %164 {offsets = [0, 96], sizes = [8, 32], strides = [1, 1]} : vector<8x128xf32> to vector<8x32xf32>
    %180 = arith.negf %179 : vector<8x32xf32>
    %181 = math.exp %180 : vector<8x32xf32>
    %cst_58 = arith.constant 1.000000e+00 : f32
    %182 = vector.broadcast %cst_58 : f32 to vector<8x32xf32>
    %183 = arith.addf %182, %181 : vector<8x32xf32>
    %184 = arith.divf %182, %183 : vector<8x32xf32>
    %185 = arith.mulf %176, %151 : vector<8x32xf32>
    %186 = arith.mulf %170, %178 : vector<8x32xf32>
    %187 = arith.addf %185, %186 : vector<8x32xf32>
    %188 = math.tanh %187 : vector<8x32xf32>
    %189 = arith.mulf %184, %188 : vector<8x32xf32>
    %c8_i32_59 = arith.constant 8 : i32
    %190 = arith.muli %c4_i32, %c8_i32_59 : i32
    %c0_i32_60 = arith.constant 0 : i32
    %191 = arith.addi %190, %c0_i32_60 : i32
    %192 = tpu.assume_multiple %191, 8 : i32
    %193 = arith.index_cast %192 : i32 to index
    %c0_61 = arith.constant 0 : index
    %194 = vector.load %arg6[%193, %c0_61] : memref<64x32xf32, #tpu.memory_space<vmem>>, vector<8x32xf32>
    tpu.vector_store %arg6[%193, %c0_61], %189 {strides = array<i32>} : memref<64x32xf32, #tpu.memory_space<vmem>>, vector<8x32xf32>,
    %c5_i32 = arith.constant 5 : i32
    %c8_i32_62 = arith.constant 8 : i32
    %195 = arith.muli %c5_i32, %c8_i32_62 : i32
    %196 = tpu.assume_multiple %195, 8 : i32
    %197 = arith.index_cast %196 : i32 to index
    %c0_63 = arith.constant 0 : index
    %198 = vector.load %arg9[%197, %c0_63] : memref<64x128xf32, #tpu.memory_space<vmem>>, vector<8x128xf32>
    %cst_64 = arith.constant dense<0.000000e+00> : vector<8x128xf32>
    %199 = tpu.matmul %189, %1, %cst_64 {dimension_numbers = #tpu.dot_dimension_numbers<[1], [0], [0], [1], [0, 0, 1, 1], [], []>} : vector<8x32xf32>, vector<32x128xf32>, vector<8x128xf32> -> vector<8x128xf32>
    %200 = arith.addf %198, %199 : vector<8x128xf32>
    %201 = vector.extract_strided_slice %200 {offsets = [0, 0], sizes = [8, 32], strides = [1, 1]} : vector<8x128xf32> to vector<8x32xf32>
    %202 = arith.negf %201 : vector<8x32xf32>
    %203 = math.exp %202 : vector<8x32xf32>
    %cst_65 = arith.constant 1.000000e+00 : f32
    %204 = vector.broadcast %cst_65 : f32 to vector<8x32xf32>
    %205 = arith.addf %204, %203 : vector<8x32xf32>
    %206 = arith.divf %204, %205 : vector<8x32xf32>
    %207 = vector.extract_strided_slice %200 {offsets = [0, 32], sizes = [8, 32], strides = [1, 1]} : vector<8x128xf32> to vector<8x32xf32>
    %208 = arith.negf %207 : vector<8x32xf32>
    %209 = math.exp %208 : vector<8x32xf32>
    %cst_66 = arith.constant 1.000000e+00 : f32
    %210 = vector.broadcast %cst_66 : f32 to vector<8x32xf32>
    %211 = arith.addf %210, %209 : vector<8x32xf32>
    %212 = arith.divf %210, %211 : vector<8x32xf32>
    %213 = vector.extract_strided_slice %200 {offsets = [0, 64], sizes = [8, 32], strides = [1, 1]} : vector<8x128xf32> to vector<8x32xf32>
    %214 = math.tanh %213 : vector<8x32xf32>
    %215 = vector.extract_strided_slice %200 {offsets = [0, 96], sizes = [8, 32], strides = [1, 1]} : vector<8x128xf32> to vector<8x32xf32>
    %216 = arith.negf %215 : vector<8x32xf32>
    %217 = math.exp %216 : vector<8x32xf32>
    %cst_67 = arith.constant 1.000000e+00 : f32
    %218 = vector.broadcast %cst_67 : f32 to vector<8x32xf32>
    %219 = arith.addf %218, %217 : vector<8x32xf32>
    %220 = arith.divf %218, %219 : vector<8x32xf32>
    %221 = arith.mulf %212, %187 : vector<8x32xf32>
    %222 = arith.mulf %206, %214 : vector<8x32xf32>
    %223 = arith.addf %221, %222 : vector<8x32xf32>
    %224 = math.tanh %223 : vector<8x32xf32>
    %225 = arith.mulf %220, %224 : vector<8x32xf32>
    %c8_i32_68 = arith.constant 8 : i32
    %226 = arith.muli %c5_i32, %c8_i32_68 : i32
    %c0_i32_69 = arith.constant 0 : i32
    %227 = arith.addi %226, %c0_i32_69 : i32
    %228 = tpu.assume_multiple %227, 8 : i32
    %229 = arith.index_cast %228 : i32 to index
    %c0_70 = arith.constant 0 : index
    %230 = vector.load %arg6[%229, %c0_70] : memref<64x32xf32, #tpu.memory_space<vmem>>, vector<8x32xf32>
    tpu.vector_store %arg6[%229, %c0_70], %225 {strides = array<i32>} : memref<64x32xf32, #tpu.memory_space<vmem>>, vector<8x32xf32>,
    %c6_i32 = arith.constant 6 : i32
    %c8_i32_71 = arith.constant 8 : i32
    %231 = arith.muli %c6_i32, %c8_i32_71 : i32
    %232 = tpu.assume_multiple %231, 8 : i32
    %233 = arith.index_cast %232 : i32 to index
    %c0_72 = arith.constant 0 : index
    %234 = vector.load %arg9[%233, %c0_72] : memref<64x128xf32, #tpu.memory_space<vmem>>, vector<8x128xf32>
    %cst_73 = arith.constant dense<0.000000e+00> : vector<8x128xf32>
    %235 = tpu.matmul %225, %1, %cst_73 {dimension_numbers = #tpu.dot_dimension_numbers<[1], [0], [0], [1], [0, 0, 1, 1], [], []>} : vector<8x32xf32>, vector<32x128xf32>, vector<8x128xf32> -> vector<8x128xf32>
    %236 = arith.addf %234, %235 : vector<8x128xf32>
    %237 = vector.extract_strided_slice %236 {offsets = [0, 0], sizes = [8, 32], strides = [1, 1]} : vector<8x128xf32> to vector<8x32xf32>
    %238 = arith.negf %237 : vector<8x32xf32>
    %239 = math.exp %238 : vector<8x32xf32>
    %cst_74 = arith.constant 1.000000e+00 : f32
    %240 = vector.broadcast %cst_74 : f32 to vector<8x32xf32>
    %241 = arith.addf %240, %239 : vector<8x32xf32>
    %242 = arith.divf %240, %241 : vector<8x32xf32>
    %243 = vector.extract_strided_slice %236 {offsets = [0, 32], sizes = [8, 32], strides = [1, 1]} : vector<8x128xf32> to vector<8x32xf32>
    %244 = arith.negf %243 : vector<8x32xf32>
    %245 = math.exp %244 : vector<8x32xf32>
    %cst_75 = arith.constant 1.000000e+00 : f32
    %246 = vector.broadcast %cst_75 : f32 to vector<8x32xf32>
    %247 = arith.addf %246, %245 : vector<8x32xf32>
    %248 = arith.divf %246, %247 : vector<8x32xf32>
    %249 = vector.extract_strided_slice %236 {offsets = [0, 64], sizes = [8, 32], strides = [1, 1]} : vector<8x128xf32> to vector<8x32xf32>
    %250 = math.tanh %249 : vector<8x32xf32>
    %251 = vector.extract_strided_slice %236 {offsets = [0, 96], sizes = [8, 32], strides = [1, 1]} : vector<8x128xf32> to vector<8x32xf32>
    %252 = arith.negf %251 : vector<8x32xf32>
    %253 = math.exp %252 : vector<8x32xf32>
    %cst_76 = arith.constant 1.000000e+00 : f32
    %254 = vector.broadcast %cst_76 : f32 to vector<8x32xf32>
    %255 = arith.addf %254, %253 : vector<8x32xf32>
    %256 = arith.divf %254, %255 : vector<8x32xf32>
    %257 = arith.mulf %248, %223 : vector<8x32xf32>
    %258 = arith.mulf %242, %250 : vector<8x32xf32>
    %259 = arith.addf %257, %258 : vector<8x32xf32>
    %260 = math.tanh %259 : vector<8x32xf32>
    %261 = arith.mulf %256, %260 : vector<8x32xf32>
    %c8_i32_77 = arith.constant 8 : i32
    %262 = arith.muli %c6_i32, %c8_i32_77 : i32
    %c0_i32_78 = arith.constant 0 : i32
    %263 = arith.addi %262, %c0_i32_78 : i32
    %264 = tpu.assume_multiple %263, 8 : i32
    %265 = arith.index_cast %264 : i32 to index
    %c0_79 = arith.constant 0 : index
    %266 = vector.load %arg6[%265, %c0_79] : memref<64x32xf32, #tpu.memory_space<vmem>>, vector<8x32xf32>
    tpu.vector_store %arg6[%265, %c0_79], %261 {strides = array<i32>} : memref<64x32xf32, #tpu.memory_space<vmem>>, vector<8x32xf32>,
    %c7_i32 = arith.constant 7 : i32
    %c8_i32_80 = arith.constant 8 : i32
    %267 = arith.muli %c7_i32, %c8_i32_80 : i32
    %268 = tpu.assume_multiple %267, 8 : i32
    %269 = arith.index_cast %268 : i32 to index
    %c0_81 = arith.constant 0 : index
    %270 = vector.load %arg9[%269, %c0_81] : memref<64x128xf32, #tpu.memory_space<vmem>>, vector<8x128xf32>
    %cst_82 = arith.constant dense<0.000000e+00> : vector<8x128xf32>
    %271 = tpu.matmul %261, %1, %cst_82 {dimension_numbers = #tpu.dot_dimension_numbers<[1], [0], [0], [1], [0, 0, 1, 1], [], []>} : vector<8x32xf32>, vector<32x128xf32>, vector<8x128xf32> -> vector<8x128xf32>
    %272 = arith.addf %270, %271 : vector<8x128xf32>
    %273 = vector.extract_strided_slice %272 {offsets = [0, 0], sizes = [8, 32], strides = [1, 1]} : vector<8x128xf32> to vector<8x32xf32>
    %274 = arith.negf %273 : vector<8x32xf32>
    %275 = math.exp %274 : vector<8x32xf32>
    %cst_83 = arith.constant 1.000000e+00 : f32
    %276 = vector.broadcast %cst_83 : f32 to vector<8x32xf32>
    %277 = arith.addf %276, %275 : vector<8x32xf32>
    %278 = arith.divf %276, %277 : vector<8x32xf32>
    %279 = vector.extract_strided_slice %272 {offsets = [0, 32], sizes = [8, 32], strides = [1, 1]} : vector<8x128xf32> to vector<8x32xf32>
    %280 = arith.negf %279 : vector<8x32xf32>
    %281 = math.exp %280 : vector<8x32xf32>
    %cst_84 = arith.constant 1.000000e+00 : f32
    %282 = vector.broadcast %cst_84 : f32 to vector<8x32xf32>
    %283 = arith.addf %282, %281 : vector<8x32xf32>
    %284 = arith.divf %282, %283 : vector<8x32xf32>
    %285 = vector.extract_strided_slice %272 {offsets = [0, 64], sizes = [8, 32], strides = [1, 1]} : vector<8x128xf32> to vector<8x32xf32>
    %286 = math.tanh %285 : vector<8x32xf32>
    %287 = vector.extract_strided_slice %272 {offsets = [0, 96], sizes = [8, 32], strides = [1, 1]} : vector<8x128xf32> to vector<8x32xf32>
    %288 = arith.negf %287 : vector<8x32xf32>
    %289 = math.exp %288 : vector<8x32xf32>
    %cst_85 = arith.constant 1.000000e+00 : f32
    %290 = vector.broadcast %cst_85 : f32 to vector<8x32xf32>
    %291 = arith.addf %290, %289 : vector<8x32xf32>
    %292 = arith.divf %290, %291 : vector<8x32xf32>
    %293 = arith.mulf %284, %259 : vector<8x32xf32>
    %294 = arith.mulf %278, %286 : vector<8x32xf32>
    %295 = arith.addf %293, %294 : vector<8x32xf32>
    %296 = math.tanh %295 : vector<8x32xf32>
    %297 = arith.mulf %292, %296 : vector<8x32xf32>
    %c8_i32_86 = arith.constant 8 : i32
    %298 = arith.muli %c7_i32, %c8_i32_86 : i32
    %c0_i32_87 = arith.constant 0 : i32
    %299 = arith.addi %298, %c0_i32_87 : i32
    %300 = tpu.assume_multiple %299, 8 : i32
    %301 = arith.index_cast %300 : i32 to index
    %c0_88 = arith.constant 0 : index
    %302 = vector.load %arg6[%301, %c0_88] : memref<64x32xf32, #tpu.memory_space<vmem>>, vector<8x32xf32>
    tpu.vector_store %arg6[%301, %c0_88], %297 {strides = array<i32>} : memref<64x32xf32, #tpu.memory_space<vmem>>, vector<8x32xf32>,
    %c8_i32_89 = arith.constant 8 : i32
    %c0_90 = arith.constant 0 : index
    %c0_91 = arith.constant 0 : index
    %c0_92 = arith.constant 0 : index
    %303 = vector.load %arg7[%c0_90, %c0_91, %c0_92] : memref<2x8x32xf32, #tpu.memory_space<vmem>>, vector<1x8x32xf32>
    %304 = vector.shape_cast %303 : vector<1x8x32xf32> to vector<8x32xf32>
    %305 = vector.shape_cast %297 : vector<8x32xf32> to vector<1x8x32xf32>
    tpu.vector_store %arg7[%c0_90, %c0_91, %c0_92], %305 {strides = array<i32>} : memref<2x8x32xf32, #tpu.memory_space<vmem>>, vector<1x8x32xf32>,
    %c0_93 = arith.constant 0 : index
    %c0_94 = arith.constant 0 : index
    %c0_95 = arith.constant 0 : index
    %306 = vector.load %arg8[%c0_93, %c0_94, %c0_95] : memref<2x8x32xf32, #tpu.memory_space<vmem>>, vector<1x8x32xf32>
    %307 = vector.shape_cast %306 : vector<1x8x32xf32> to vector<8x32xf32>
    %308 = vector.shape_cast %295 : vector<8x32xf32> to vector<1x8x32xf32>
    tpu.vector_store %arg8[%c0_93, %c0_94, %c0_95], %308 {strides = array<i32>} : memref<2x8x32xf32, #tpu.memory_space<vmem>>, vector<1x8x32xf32>,
    %c1 = arith.constant 1 : index
    %c0_96 = arith.constant 0 : index
    %c0_97 = arith.constant 0 : index
    %309 = vector.load %arg2[%c1, %c0_96, %c0_97] : memref<2x32x128xf32, #tpu.memory_space<vmem>>, vector<1x32x128xf32>
    %310 = vector.shape_cast %309 : vector<1x32x128xf32> to vector<32x128xf32>
    %c1_98 = arith.constant 1 : index
    %c0_99 = arith.constant 0 : index
    %c0_100 = arith.constant 0 : index
    %311 = vector.load %arg3[%c1_98, %c0_99, %c0_100] : memref<2x1x128xf32, #tpu.memory_space<vmem>>, vector<1x1x128xf32>
    %312 = vector.shape_cast %311 : vector<1x1x128xf32> to vector<1x128xf32>
    %c1_101 = arith.constant 1 : index
    %c0_102 = arith.constant 0 : index
    %c0_103 = arith.constant 0 : index
    %313 = vector.load %arg4[%c1_101, %c0_102, %c0_103] : memref<2x8x32xf32, #tpu.memory_space<vmem>>, vector<1x8x32xf32>
    %314 = vector.shape_cast %313 : vector<1x8x32xf32> to vector<8x32xf32>
    %c1_104 = arith.constant 1 : index
    %c0_105 = arith.constant 0 : index
    %c0_106 = arith.constant 0 : index
    %315 = vector.load %arg5[%c1_104, %c0_105, %c0_106] : memref<2x8x32xf32, #tpu.memory_space<vmem>>, vector<1x8x32xf32>
    %316 = vector.shape_cast %315 : vector<1x8x32xf32> to vector<8x32xf32>
    %c0_107 = arith.constant 0 : index
    %c0_108 = arith.constant 0 : index
    %317 = vector.load %arg6[%c0_107, %c0_108] : memref<64x32xf32, #tpu.memory_space<vmem>>, vector<64x32xf32>
    %c1_109 = arith.constant 1 : index
    %c0_110 = arith.constant 0 : index
    %c0_111 = arith.constant 0 : index
    %318 = vector.load %arg1[%c1_109, %c0_110, %c0_111] : memref<2x32x128xf32, #tpu.memory_space<vmem>>, vector<1x32x128xf32>
    %319 = vector.shape_cast %318 : vector<1x32x128xf32> to vector<32x128xf32>
    %cst_112 = arith.constant dense<0.000000e+00> : vector<64x128xf32>
    %320 = tpu.matmul %317, %319, %cst_112 {dimension_numbers = #tpu.dot_dimension_numbers<[1], [0], [0], [1], [0, 0, 1, 1], [], []>} : vector<64x32xf32>, vector<32x128xf32>, vector<64x128xf32> -> vector<64x128xf32>
    %321 = vector.broadcast %312 : vector<1x128xf32> to vector<64x128xf32>
    %322 = arith.addf %320, %321 : vector<64x128xf32>
    %c0_113 = arith.constant 0 : index
    %c0_114 = arith.constant 0 : index
    %323 = vector.load %arg9[%c0_113, %c0_114] : memref<64x128xf32, #tpu.memory_space<vmem>>, vector<64x128xf32>
    tpu.vector_store %arg9[%c0_113, %c0_114], %322 {strides = array<i32>} : memref<64x128xf32, #tpu.memory_space<vmem>>, vector<64x128xf32>,
    %c0_i32_115 = arith.constant 0 : i32
    %c8_i32_116 = arith.constant 8 : i32
    %324 = arith.muli %c0_i32_115, %c8_i32_116 : i32
    %325 = tpu.assume_multiple %324, 8 : i32
    %326 = arith.index_cast %325 : i32 to index
    %c0_117 = arith.constant 0 : index
    %327 = vector.load %arg9[%326, %c0_117] : memref<64x128xf32, #tpu.memory_space<vmem>>, vector<8x128xf32>
    %cst_118 = arith.constant dense<0.000000e+00> : vector<8x128xf32>
    %328 = tpu.matmul %314, %310, %cst_118 {dimension_numbers = #tpu.dot_dimension_numbers<[1], [0], [0], [1], [0, 0, 1, 1], [], []>} : vector<8x32xf32>, vector<32x128xf32>, vector<8x128xf32> -> vector<8x128xf32>
    %329 = arith.addf %327, %328 : vector<8x128xf32>
    %330 = vector.extract_strided_slice %329 {offsets = [0, 0], sizes = [8, 32], strides = [1, 1]} : vector<8x128xf32> to vector<8x32xf32>
    %331 = arith.negf %330 : vector<8x32xf32>
    %332 = math.exp %331 : vector<8x32xf32>
    %cst_119 = arith.constant 1.000000e+00 : f32
    %333 = vector.broadcast %cst_119 : f32 to vector<8x32xf32>
    %334 = arith.addf %333, %332 : vector<8x32xf32>
    %335 = arith.divf %333, %334 : vector<8x32xf32>
    %336 = vector.extract_strided_slice %329 {offsets = [0, 32], sizes = [8, 32], strides = [1, 1]} : vector<8x128xf32> to vector<8x32xf32>
    %337 = arith.negf %336 : vector<8x32xf32>
    %338 = math.exp %337 : vector<8x32xf32>
    %cst_120 = arith.constant 1.000000e+00 : f32
    %339 = vector.broadcast %cst_120 : f32 to vector<8x32xf32>
    %340 = arith.addf %339, %338 : vector<8x32xf32>
    %341 = arith.divf %339, %340 : vector<8x32xf32>
    %342 = vector.extract_strided_slice %329 {offsets = [0, 64], sizes = [8, 32], strides = [1, 1]} : vector<8x128xf32> to vector<8x32xf32>
    %343 = math.tanh %342 : vector<8x32xf32>
    %344 = vector.extract_strided_slice %329 {offsets = [0, 96], sizes = [8, 32], strides = [1, 1]} : vector<8x128xf32> to vector<8x32xf32>
    %345 = arith.negf %344 : vector<8x32xf32>
    %346 = math.exp %345 : vector<8x32xf32>
    %cst_121 = arith.constant 1.000000e+00 : f32
    %347 = vector.broadcast %cst_121 : f32 to vector<8x32xf32>
    %348 = arith.addf %347, %346 : vector<8x32xf32>
    %349 = arith.divf %347, %348 : vector<8x32xf32>
    %350 = arith.mulf %341, %316 : vector<8x32xf32>
    %351 = arith.mulf %335, %343 : vector<8x32xf32>
    %352 = arith.addf %350, %351 : vector<8x32xf32>
    %353 = math.tanh %352 : vector<8x32xf32>
    %354 = arith.mulf %349, %353 : vector<8x32xf32>
    %c8_i32_122 = arith.constant 8 : i32
    %355 = arith.muli %c0_i32_115, %c8_i32_122 : i32
    %c0_i32_123 = arith.constant 0 : i32
    %356 = arith.addi %355, %c0_i32_123 : i32
    %357 = tpu.assume_multiple %356, 8 : i32
    %358 = arith.index_cast %357 : i32 to index
    %c0_124 = arith.constant 0 : index
    %359 = vector.load %arg6[%358, %c0_124] : memref<64x32xf32, #tpu.memory_space<vmem>>, vector<8x32xf32>
    tpu.vector_store %arg6[%358, %c0_124], %354 {strides = array<i32>} : memref<64x32xf32, #tpu.memory_space<vmem>>, vector<8x32xf32>,
    %c1_i32_125 = arith.constant 1 : i32
    %c8_i32_126 = arith.constant 8 : i32
    %360 = arith.muli %c1_i32_125, %c8_i32_126 : i32
    %361 = tpu.assume_multiple %360, 8 : i32
    %362 = arith.index_cast %361 : i32 to index
    %c0_127 = arith.constant 0 : index
    %363 = vector.load %arg9[%362, %c0_127] : memref<64x128xf32, #tpu.memory_space<vmem>>, vector<8x128xf32>
    %cst_128 = arith.constant dense<0.000000e+00> : vector<8x128xf32>
    %364 = tpu.matmul %354, %310, %cst_128 {dimension_numbers = #tpu.dot_dimension_numbers<[1], [0], [0], [1], [0, 0, 1, 1], [], []>} : vector<8x32xf32>, vector<32x128xf32>, vector<8x128xf32> -> vector<8x128xf32>
    %365 = arith.addf %363, %364 : vector<8x128xf32>
    %366 = vector.extract_strided_slice %365 {offsets = [0, 0], sizes = [8, 32], strides = [1, 1]} : vector<8x128xf32> to vector<8x32xf32>
    %367 = arith.negf %366 : vector<8x32xf32>
    %368 = math.exp %367 : vector<8x32xf32>
    %cst_129 = arith.constant 1.000000e+00 : f32
    %369 = vector.broadcast %cst_129 : f32 to vector<8x32xf32>
    %370 = arith.addf %369, %368 : vector<8x32xf32>
    %371 = arith.divf %369, %370 : vector<8x32xf32>
    %372 = vector.extract_strided_slice %365 {offsets = [0, 32], sizes = [8, 32], strides = [1, 1]} : vector<8x128xf32> to vector<8x32xf32>
    %373 = arith.negf %372 : vector<8x32xf32>
    %374 = math.exp %373 : vector<8x32xf32>
    %cst_130 = arith.constant 1.000000e+00 : f32
    %375 = vector.broadcast %cst_130 : f32 to vector<8x32xf32>
    %376 = arith.addf %375, %374 : vector<8x32xf32>
    %377 = arith.divf %375, %376 : vector<8x32xf32>
    %378 = vector.extract_strided_slice %365 {offsets = [0, 64], sizes = [8, 32], strides = [1, 1]} : vector<8x128xf32> to vector<8x32xf32>
    %379 = math.tanh %378 : vector<8x32xf32>
    %380 = vector.extract_strided_slice %365 {offsets = [0, 96], sizes = [8, 32], strides = [1, 1]} : vector<8x128xf32> to vector<8x32xf32>
    %381 = arith.negf %380 : vector<8x32xf32>
    %382 = math.exp %381 : vector<8x32xf32>
    %cst_131 = arith.constant 1.000000e+00 : f32
    %383 = vector.broadcast %cst_131 : f32 to vector<8x32xf32>
    %384 = arith.addf %383, %382 : vector<8x32xf32>
    %385 = arith.divf %383, %384 : vector<8x32xf32>
    %386 = arith.mulf %377, %352 : vector<8x32xf32>
    %387 = arith.mulf %371, %379 : vector<8x32xf32>
    %388 = arith.addf %386, %387 : vector<8x32xf32>
    %389 = math.tanh %388 : vector<8x32xf32>
    %390 = arith.mulf %385, %389 : vector<8x32xf32>
    %c8_i32_132 = arith.constant 8 : i32
    %391 = arith.muli %c1_i32_125, %c8_i32_132 : i32
    %c0_i32_133 = arith.constant 0 : i32
    %392 = arith.addi %391, %c0_i32_133 : i32
    %393 = tpu.assume_multiple %392, 8 : i32
    %394 = arith.index_cast %393 : i32 to index
    %c0_134 = arith.constant 0 : index
    %395 = vector.load %arg6[%394, %c0_134] : memref<64x32xf32, #tpu.memory_space<vmem>>, vector<8x32xf32>
    tpu.vector_store %arg6[%394, %c0_134], %390 {strides = array<i32>} : memref<64x32xf32, #tpu.memory_space<vmem>>, vector<8x32xf32>,
    %c2_i32_135 = arith.constant 2 : i32
    %c8_i32_136 = arith.constant 8 : i32
    %396 = arith.muli %c2_i32_135, %c8_i32_136 : i32
    %397 = tpu.assume_multiple %396, 8 : i32
    %398 = arith.index_cast %397 : i32 to index
    %c0_137 = arith.constant 0 : index
    %399 = vector.load %arg9[%398, %c0_137] : memref<64x128xf32, #tpu.memory_space<vmem>>, vector<8x128xf32>
    %cst_138 = arith.constant dense<0.000000e+00> : vector<8x128xf32>
    %400 = tpu.matmul %390, %310, %cst_138 {dimension_numbers = #tpu.dot_dimension_numbers<[1], [0], [0], [1], [0, 0, 1, 1], [], []>} : vector<8x32xf32>, vector<32x128xf32>, vector<8x128xf32> -> vector<8x128xf32>
    %401 = arith.addf %399, %400 : vector<8x128xf32>
    %402 = vector.extract_strided_slice %401 {offsets = [0, 0], sizes = [8, 32], strides = [1, 1]} : vector<8x128xf32> to vector<8x32xf32>
    %403 = arith.negf %402 : vector<8x32xf32>
    %404 = math.exp %403 : vector<8x32xf32>
    %cst_139 = arith.constant 1.000000e+00 : f32
    %405 = vector.broadcast %cst_139 : f32 to vector<8x32xf32>
    %406 = arith.addf %405, %404 : vector<8x32xf32>
    %407 = arith.divf %405, %406 : vector<8x32xf32>
    %408 = vector.extract_strided_slice %401 {offsets = [0, 32], sizes = [8, 32], strides = [1, 1]} : vector<8x128xf32> to vector<8x32xf32>
    %409 = arith.negf %408 : vector<8x32xf32>
    %410 = math.exp %409 : vector<8x32xf32>
    %cst_140 = arith.constant 1.000000e+00 : f32
    %411 = vector.broadcast %cst_140 : f32 to vector<8x32xf32>
    %412 = arith.addf %411, %410 : vector<8x32xf32>
    %413 = arith.divf %411, %412 : vector<8x32xf32>
    %414 = vector.extract_strided_slice %401 {offsets = [0, 64], sizes = [8, 32], strides = [1, 1]} : vector<8x128xf32> to vector<8x32xf32>
    %415 = math.tanh %414 : vector<8x32xf32>
    %416 = vector.extract_strided_slice %401 {offsets = [0, 96], sizes = [8, 32], strides = [1, 1]} : vector<8x128xf32> to vector<8x32xf32>
    %417 = arith.negf %416 : vector<8x32xf32>
    %418 = math.exp %417 : vector<8x32xf32>
    %cst_141 = arith.constant 1.000000e+00 : f32
    %419 = vector.broadcast %cst_141 : f32 to vector<8x32xf32>
    %420 = arith.addf %419, %418 : vector<8x32xf32>
    %421 = arith.divf %419, %420 : vector<8x32xf32>
    %422 = arith.mulf %413, %388 : vector<8x32xf32>
    %423 = arith.mulf %407, %415 : vector<8x32xf32>
    %424 = arith.addf %422, %423 : vector<8x32xf32>
    %425 = math.tanh %424 : vector<8x32xf32>
    %426 = arith.mulf %421, %425 : vector<8x32xf32>
    %c8_i32_142 = arith.constant 8 : i32
    %427 = arith.muli %c2_i32_135, %c8_i32_142 : i32
    %c0_i32_143 = arith.constant 0 : i32
    %428 = arith.addi %427, %c0_i32_143 : i32
    %429 = tpu.assume_multiple %428, 8 : i32
    %430 = arith.index_cast %429 : i32 to index
    %c0_144 = arith.constant 0 : index
    %431 = vector.load %arg6[%430, %c0_144] : memref<64x32xf32, #tpu.memory_space<vmem>>, vector<8x32xf32>
    tpu.vector_store %arg6[%430, %c0_144], %426 {strides = array<i32>} : memref<64x32xf32, #tpu.memory_space<vmem>>, vector<8x32xf32>,
    %c3_i32_145 = arith.constant 3 : i32
    %c8_i32_146 = arith.constant 8 : i32
    %432 = arith.muli %c3_i32_145, %c8_i32_146 : i32
    %433 = tpu.assume_multiple %432, 8 : i32
    %434 = arith.index_cast %433 : i32 to index
    %c0_147 = arith.constant 0 : index
    %435 = vector.load %arg9[%434, %c0_147] : memref<64x128xf32, #tpu.memory_space<vmem>>, vector<8x128xf32>
    %cst_148 = arith.constant dense<0.000000e+00> : vector<8x128xf32>
    %436 = tpu.matmul %426, %310, %cst_148 {dimension_numbers = #tpu.dot_dimension_numbers<[1], [0], [0], [1], [0, 0, 1, 1], [], []>} : vector<8x32xf32>, vector<32x128xf32>, vector<8x128xf32> -> vector<8x128xf32>
    %437 = arith.addf %435, %436 : vector<8x128xf32>
    %438 = vector.extract_strided_slice %437 {offsets = [0, 0], sizes = [8, 32], strides = [1, 1]} : vector<8x128xf32> to vector<8x32xf32>
    %439 = arith.negf %438 : vector<8x32xf32>
    %440 = math.exp %439 : vector<8x32xf32>
    %cst_149 = arith.constant 1.000000e+00 : f32
    %441 = vector.broadcast %cst_149 : f32 to vector<8x32xf32>
    %442 = arith.addf %441, %440 : vector<8x32xf32>
    %443 = arith.divf %441, %442 : vector<8x32xf32>
    %444 = vector.extract_strided_slice %437 {offsets = [0, 32], sizes = [8, 32], strides = [1, 1]} : vector<8x128xf32> to vector<8x32xf32>
    %445 = arith.negf %444 : vector<8x32xf32>
    %446 = math.exp %445 : vector<8x32xf32>
    %cst_150 = arith.constant 1.000000e+00 : f32
    %447 = vector.broadcast %cst_150 : f32 to vector<8x32xf32>
    %448 = arith.addf %447, %446 : vector<8x32xf32>
    %449 = arith.divf %447, %448 : vector<8x32xf32>
    %450 = vector.extract_strided_slice %437 {offsets = [0, 64], sizes = [8, 32], strides = [1, 1]} : vector<8x128xf32> to vector<8x32xf32>
    %451 = math.tanh %450 : vector<8x32xf32>
    %452 = vector.extract_strided_slice %437 {offsets = [0, 96], sizes = [8, 32], strides = [1, 1]} : vector<8x128xf32> to vector<8x32xf32>
    %453 = arith.negf %452 : vector<8x32xf32>
    %454 = math.exp %453 : vector<8x32xf32>
    %cst_151 = arith.constant 1.000000e+00 : f32
    %455 = vector.broadcast %cst_151 : f32 to vector<8x32xf32>
    %456 = arith.addf %455, %454 : vector<8x32xf32>
    %457 = arith.divf %455, %456 : vector<8x32xf32>
    %458 = arith.mulf %449, %424 : vector<8x32xf32>
    %459 = arith.mulf %443, %451 : vector<8x32xf32>
    %460 = arith.addf %458, %459 : vector<8x32xf32>
    %461 = math.tanh %460 : vector<8x32xf32>
    %462 = arith.mulf %457, %461 : vector<8x32xf32>
    %c8_i32_152 = arith.constant 8 : i32
    %463 = arith.muli %c3_i32_145, %c8_i32_152 : i32
    %c0_i32_153 = arith.constant 0 : i32
    %464 = arith.addi %463, %c0_i32_153 : i32
    %465 = tpu.assume_multiple %464, 8 : i32
    %466 = arith.index_cast %465 : i32 to index
    %c0_154 = arith.constant 0 : index
    %467 = vector.load %arg6[%466, %c0_154] : memref<64x32xf32, #tpu.memory_space<vmem>>, vector<8x32xf32>
    tpu.vector_store %arg6[%466, %c0_154], %462 {strides = array<i32>} : memref<64x32xf32, #tpu.memory_space<vmem>>, vector<8x32xf32>,
    %c4_i32_155 = arith.constant 4 : i32
    %c8_i32_156 = arith.constant 8 : i32
    %468 = arith.muli %c4_i32_155, %c8_i32_156 : i32
    %469 = tpu.assume_multiple %468, 8 : i32
    %470 = arith.index_cast %469 : i32 to index
    %c0_157 = arith.constant 0 : index
    %471 = vector.load %arg9[%470, %c0_157] : memref<64x128xf32, #tpu.memory_space<vmem>>, vector<8x128xf32>
    %cst_158 = arith.constant dense<0.000000e+00> : vector<8x128xf32>
    %472 = tpu.matmul %462, %310, %cst_158 {dimension_numbers = #tpu.dot_dimension_numbers<[1], [0], [0], [1], [0, 0, 1, 1], [], []>} : vector<8x32xf32>, vector<32x128xf32>, vector<8x128xf32> -> vector<8x128xf32>
    %473 = arith.addf %471, %472 : vector<8x128xf32>
    %474 = vector.extract_strided_slice %473 {offsets = [0, 0], sizes = [8, 32], strides = [1, 1]} : vector<8x128xf32> to vector<8x32xf32>
    %475 = arith.negf %474 : vector<8x32xf32>
    %476 = math.exp %475 : vector<8x32xf32>
    %cst_159 = arith.constant 1.000000e+00 : f32
    %477 = vector.broadcast %cst_159 : f32 to vector<8x32xf32>
    %478 = arith.addf %477, %476 : vector<8x32xf32>
    %479 = arith.divf %477, %478 : vector<8x32xf32>
    %480 = vector.extract_strided_slice %473 {offsets = [0, 32], sizes = [8, 32], strides = [1, 1]} : vector<8x128xf32> to vector<8x32xf32>
    %481 = arith.negf %480 : vector<8x32xf32>
    %482 = math.exp %481 : vector<8x32xf32>
    %cst_160 = arith.constant 1.000000e+00 : f32
    %483 = vector.broadcast %cst_160 : f32 to vector<8x32xf32>
    %484 = arith.addf %483, %482 : vector<8x32xf32>
    %485 = arith.divf %483, %484 : vector<8x32xf32>
    %486 = vector.extract_strided_slice %473 {offsets = [0, 64], sizes = [8, 32], strides = [1, 1]} : vector<8x128xf32> to vector<8x32xf32>
    %487 = math.tanh %486 : vector<8x32xf32>
    %488 = vector.extract_strided_slice %473 {offsets = [0, 96], sizes = [8, 32], strides = [1, 1]} : vector<8x128xf32> to vector<8x32xf32>
    %489 = arith.negf %488 : vector<8x32xf32>
    %490 = math.exp %489 : vector<8x32xf32>
    %cst_161 = arith.constant 1.000000e+00 : f32
    %491 = vector.broadcast %cst_161 : f32 to vector<8x32xf32>
    %492 = arith.addf %491, %490 : vector<8x32xf32>
    %493 = arith.divf %491, %492 : vector<8x32xf32>
    %494 = arith.mulf %485, %460 : vector<8x32xf32>
    %495 = arith.mulf %479, %487 : vector<8x32xf32>
    %496 = arith.addf %494, %495 : vector<8x32xf32>
    %497 = math.tanh %496 : vector<8x32xf32>
    %498 = arith.mulf %493, %497 : vector<8x32xf32>
    %c8_i32_162 = arith.constant 8 : i32
    %499 = arith.muli %c4_i32_155, %c8_i32_162 : i32
    %c0_i32_163 = arith.constant 0 : i32
    %500 = arith.addi %499, %c0_i32_163 : i32
    %501 = tpu.assume_multiple %500, 8 : i32
    %502 = arith.index_cast %501 : i32 to index
    %c0_164 = arith.constant 0 : index
    %503 = vector.load %arg6[%502, %c0_164] : memref<64x32xf32, #tpu.memory_space<vmem>>, vector<8x32xf32>
    tpu.vector_store %arg6[%502, %c0_164], %498 {strides = array<i32>} : memref<64x32xf32, #tpu.memory_space<vmem>>, vector<8x32xf32>,
    %c5_i32_165 = arith.constant 5 : i32
    %c8_i32_166 = arith.constant 8 : i32
    %504 = arith.muli %c5_i32_165, %c8_i32_166 : i32
    %505 = tpu.assume_multiple %504, 8 : i32
    %506 = arith.index_cast %505 : i32 to index
    %c0_167 = arith.constant 0 : index
    %507 = vector.load %arg9[%506, %c0_167] : memref<64x128xf32, #tpu.memory_space<vmem>>, vector<8x128xf32>
    %cst_168 = arith.constant dense<0.000000e+00> : vector<8x128xf32>
    %508 = tpu.matmul %498, %310, %cst_168 {dimension_numbers = #tpu.dot_dimension_numbers<[1], [0], [0], [1], [0, 0, 1, 1], [], []>} : vector<8x32xf32>, vector<32x128xf32>, vector<8x128xf32> -> vector<8x128xf32>
    %509 = arith.addf %507, %508 : vector<8x128xf32>
    %510 = vector.extract_strided_slice %509 {offsets = [0, 0], sizes = [8, 32], strides = [1, 1]} : vector<8x128xf32> to vector<8x32xf32>
    %511 = arith.negf %510 : vector<8x32xf32>
    %512 = math.exp %511 : vector<8x32xf32>
    %cst_169 = arith.constant 1.000000e+00 : f32
    %513 = vector.broadcast %cst_169 : f32 to vector<8x32xf32>
    %514 = arith.addf %513, %512 : vector<8x32xf32>
    %515 = arith.divf %513, %514 : vector<8x32xf32>
    %516 = vector.extract_strided_slice %509 {offsets = [0, 32], sizes = [8, 32], strides = [1, 1]} : vector<8x128xf32> to vector<8x32xf32>
    %517 = arith.negf %516 : vector<8x32xf32>
    %518 = math.exp %517 : vector<8x32xf32>
    %cst_170 = arith.constant 1.000000e+00 : f32
    %519 = vector.broadcast %cst_170 : f32 to vector<8x32xf32>
    %520 = arith.addf %519, %518 : vector<8x32xf32>
    %521 = arith.divf %519, %520 : vector<8x32xf32>
    %522 = vector.extract_strided_slice %509 {offsets = [0, 64], sizes = [8, 32], strides = [1, 1]} : vector<8x128xf32> to vector<8x32xf32>
    %523 = math.tanh %522 : vector<8x32xf32>
    %524 = vector.extract_strided_slice %509 {offsets = [0, 96], sizes = [8, 32], strides = [1, 1]} : vector<8x128xf32> to vector<8x32xf32>
    %525 = arith.negf %524 : vector<8x32xf32>
    %526 = math.exp %525 : vector<8x32xf32>
    %cst_171 = arith.constant 1.000000e+00 : f32
    %527 = vector.broadcast %cst_171 : f32 to vector<8x32xf32>
    %528 = arith.addf %527, %526 : vector<8x32xf32>
    %529 = arith.divf %527, %528 : vector<8x32xf32>
    %530 = arith.mulf %521, %496 : vector<8x32xf32>
    %531 = arith.mulf %515, %523 : vector<8x32xf32>
    %532 = arith.addf %530, %531 : vector<8x32xf32>
    %533 = math.tanh %532 : vector<8x32xf32>
    %534 = arith.mulf %529, %533 : vector<8x32xf32>
    %c8_i32_172 = arith.constant 8 : i32
    %535 = arith.muli %c5_i32_165, %c8_i32_172 : i32
    %c0_i32_173 = arith.constant 0 : i32
    %536 = arith.addi %535, %c0_i32_173 : i32
    %537 = tpu.assume_multiple %536, 8 : i32
    %538 = arith.index_cast %537 : i32 to index
    %c0_174 = arith.constant 0 : index
    %539 = vector.load %arg6[%538, %c0_174] : memref<64x32xf32, #tpu.memory_space<vmem>>, vector<8x32xf32>
    tpu.vector_store %arg6[%538, %c0_174], %534 {strides = array<i32>} : memref<64x32xf32, #tpu.memory_space<vmem>>, vector<8x32xf32>,
    %c6_i32_175 = arith.constant 6 : i32
    %c8_i32_176 = arith.constant 8 : i32
    %540 = arith.muli %c6_i32_175, %c8_i32_176 : i32
    %541 = tpu.assume_multiple %540, 8 : i32
    %542 = arith.index_cast %541 : i32 to index
    %c0_177 = arith.constant 0 : index
    %543 = vector.load %arg9[%542, %c0_177] : memref<64x128xf32, #tpu.memory_space<vmem>>, vector<8x128xf32>
    %cst_178 = arith.constant dense<0.000000e+00> : vector<8x128xf32>
    %544 = tpu.matmul %534, %310, %cst_178 {dimension_numbers = #tpu.dot_dimension_numbers<[1], [0], [0], [1], [0, 0, 1, 1], [], []>} : vector<8x32xf32>, vector<32x128xf32>, vector<8x128xf32> -> vector<8x128xf32>
    %545 = arith.addf %543, %544 : vector<8x128xf32>
    %546 = vector.extract_strided_slice %545 {offsets = [0, 0], sizes = [8, 32], strides = [1, 1]} : vector<8x128xf32> to vector<8x32xf32>
    %547 = arith.negf %546 : vector<8x32xf32>
    %548 = math.exp %547 : vector<8x32xf32>
    %cst_179 = arith.constant 1.000000e+00 : f32
    %549 = vector.broadcast %cst_179 : f32 to vector<8x32xf32>
    %550 = arith.addf %549, %548 : vector<8x32xf32>
    %551 = arith.divf %549, %550 : vector<8x32xf32>
    %552 = vector.extract_strided_slice %545 {offsets = [0, 32], sizes = [8, 32], strides = [1, 1]} : vector<8x128xf32> to vector<8x32xf32>
    %553 = arith.negf %552 : vector<8x32xf32>
    %554 = math.exp %553 : vector<8x32xf32>
    %cst_180 = arith.constant 1.000000e+00 : f32
    %555 = vector.broadcast %cst_180 : f32 to vector<8x32xf32>
    %556 = arith.addf %555, %554 : vector<8x32xf32>
    %557 = arith.divf %555, %556 : vector<8x32xf32>
    %558 = vector.extract_strided_slice %545 {offsets = [0, 64], sizes = [8, 32], strides = [1, 1]} : vector<8x128xf32> to vector<8x32xf32>
    %559 = math.tanh %558 : vector<8x32xf32>
    %560 = vector.extract_strided_slice %545 {offsets = [0, 96], sizes = [8, 32], strides = [1, 1]} : vector<8x128xf32> to vector<8x32xf32>
    %561 = arith.negf %560 : vector<8x32xf32>
    %562 = math.exp %561 : vector<8x32xf32>
    %cst_181 = arith.constant 1.000000e+00 : f32
    %563 = vector.broadcast %cst_181 : f32 to vector<8x32xf32>
    %564 = arith.addf %563, %562 : vector<8x32xf32>
    %565 = arith.divf %563, %564 : vector<8x32xf32>
    %566 = arith.mulf %557, %532 : vector<8x32xf32>
    %567 = arith.mulf %551, %559 : vector<8x32xf32>
    %568 = arith.addf %566, %567 : vector<8x32xf32>
    %569 = math.tanh %568 : vector<8x32xf32>
    %570 = arith.mulf %565, %569 : vector<8x32xf32>
    %c8_i32_182 = arith.constant 8 : i32
    %571 = arith.muli %c6_i32_175, %c8_i32_182 : i32
    %c0_i32_183 = arith.constant 0 : i32
    %572 = arith.addi %571, %c0_i32_183 : i32
    %573 = tpu.assume_multiple %572, 8 : i32
    %574 = arith.index_cast %573 : i32 to index
    %c0_184 = arith.constant 0 : index
    %575 = vector.load %arg6[%574, %c0_184] : memref<64x32xf32, #tpu.memory_space<vmem>>, vector<8x32xf32>
    tpu.vector_store %arg6[%574, %c0_184], %570 {strides = array<i32>} : memref<64x32xf32, #tpu.memory_space<vmem>>, vector<8x32xf32>,
    %c7_i32_185 = arith.constant 7 : i32
    %c8_i32_186 = arith.constant 8 : i32
    %576 = arith.muli %c7_i32_185, %c8_i32_186 : i32
    %577 = tpu.assume_multiple %576, 8 : i32
    %578 = arith.index_cast %577 : i32 to index
    %c0_187 = arith.constant 0 : index
    %579 = vector.load %arg9[%578, %c0_187] : memref<64x128xf32, #tpu.memory_space<vmem>>, vector<8x128xf32>
    %cst_188 = arith.constant dense<0.000000e+00> : vector<8x128xf32>
    %580 = tpu.matmul %570, %310, %cst_188 {dimension_numbers = #tpu.dot_dimension_numbers<[1], [0], [0], [1], [0, 0, 1, 1], [], []>} : vector<8x32xf32>, vector<32x128xf32>, vector<8x128xf32> -> vector<8x128xf32>
    %581 = arith.addf %579, %580 : vector<8x128xf32>
    %582 = vector.extract_strided_slice %581 {offsets = [0, 0], sizes = [8, 32], strides = [1, 1]} : vector<8x128xf32> to vector<8x32xf32>
    %583 = arith.negf %582 : vector<8x32xf32>
    %584 = math.exp %583 : vector<8x32xf32>
    %cst_189 = arith.constant 1.000000e+00 : f32
    %585 = vector.broadcast %cst_189 : f32 to vector<8x32xf32>
    %586 = arith.addf %585, %584 : vector<8x32xf32>
    %587 = arith.divf %585, %586 : vector<8x32xf32>
    %588 = vector.extract_strided_slice %581 {offsets = [0, 32], sizes = [8, 32], strides = [1, 1]} : vector<8x128xf32> to vector<8x32xf32>
    %589 = arith.negf %588 : vector<8x32xf32>
    %590 = math.exp %589 : vector<8x32xf32>
    %cst_190 = arith.constant 1.000000e+00 : f32
    %591 = vector.broadcast %cst_190 : f32 to vector<8x32xf32>
    %592 = arith.addf %591, %590 : vector<8x32xf32>
    %593 = arith.divf %591, %592 : vector<8x32xf32>
    %594 = vector.extract_strided_slice %581 {offsets = [0, 64], sizes = [8, 32], strides = [1, 1]} : vector<8x128xf32> to vector<8x32xf32>
    %595 = math.tanh %594 : vector<8x32xf32>
    %596 = vector.extract_strided_slice %581 {offsets = [0, 96], sizes = [8, 32], strides = [1, 1]} : vector<8x128xf32> to vector<8x32xf32>
    %597 = arith.negf %596 : vector<8x32xf32>
    %598 = math.exp %597 : vector<8x32xf32>
    %cst_191 = arith.constant 1.000000e+00 : f32
    %599 = vector.broadcast %cst_191 : f32 to vector<8x32xf32>
    %600 = arith.addf %599, %598 : vector<8x32xf32>
    %601 = arith.divf %599, %600 : vector<8x32xf32>
    %602 = arith.mulf %593, %568 : vector<8x32xf32>
    %603 = arith.mulf %587, %595 : vector<8x32xf32>
    %604 = arith.addf %602, %603 : vector<8x32xf32>
    %605 = math.tanh %604 : vector<8x32xf32>
    %606 = arith.mulf %601, %605 : vector<8x32xf32>
    %c8_i32_192 = arith.constant 8 : i32
    %607 = arith.muli %c7_i32_185, %c8_i32_192 : i32
    %c0_i32_193 = arith.constant 0 : i32
    %608 = arith.addi %607, %c0_i32_193 : i32
    %609 = tpu.assume_multiple %608, 8 : i32
    %610 = arith.index_cast %609 : i32 to index
    %c0_194 = arith.constant 0 : index
    %611 = vector.load %arg6[%610, %c0_194] : memref<64x32xf32, #tpu.memory_space<vmem>>, vector<8x32xf32>
    tpu.vector_store %arg6[%610, %c0_194], %606 {strides = array<i32>} : memref<64x32xf32, #tpu.memory_space<vmem>>, vector<8x32xf32>,
    %c8_i32_195 = arith.constant 8 : i32
    %c1_196 = arith.constant 1 : index
    %c0_197 = arith.constant 0 : index
    %c0_198 = arith.constant 0 : index
    %612 = vector.load %arg7[%c1_196, %c0_197, %c0_198] : memref<2x8x32xf32, #tpu.memory_space<vmem>>, vector<1x8x32xf32>
    %613 = vector.shape_cast %612 : vector<1x8x32xf32> to vector<8x32xf32>
    %614 = vector.shape_cast %606 : vector<8x32xf32> to vector<1x8x32xf32>
    tpu.vector_store %arg7[%c1_196, %c0_197, %c0_198], %614 {strides = array<i32>} : memref<2x8x32xf32, #tpu.memory_space<vmem>>, vector<1x8x32xf32>,
    %c1_199 = arith.constant 1 : index
    %c0_200 = arith.constant 0 : index
    %c0_201 = arith.constant 0 : index
    %615 = vector.load %arg8[%c1_199, %c0_200, %c0_201] : memref<2x8x32xf32, #tpu.memory_space<vmem>>, vector<1x8x32xf32>
    %616 = vector.shape_cast %615 : vector<1x8x32xf32> to vector<8x32xf32>
    %617 = vector.shape_cast %604 : vector<8x32xf32> to vector<1x8x32xf32>
    tpu.vector_store %arg8[%c1_199, %c0_200, %c0_201], %617 {strides = array<i32>} : memref<2x8x32xf32, #tpu.memory_space<vmem>>, vector<1x8x32xf32>,
    return
  }
}

</mosaic_0001>

<bundles_post_ra>
// kernel: tpu_custom_call.1
= control target key start
LH: loop header
LB: loop body
LE: loop exit
PB: predicated region body
PF: predicated region fallthrough
CT: control target
= control target key end

     0   :  { %14 = vsyncpa [#allocation4], 0  ;;  %s3250_s0 = inlined_call_operand.vmem [shape: f32[64,32], index: 0, kind: input, shape index: {}]   ;;  %s3251_s1 = inlined_call_operand.vmem [shape: f32[2,32,128], index: 1, kind: input, shape index: {}]   ;;  %s3252_s2 = inlined_call_operand.hbm [shape: f32[2,32,128], index: 2, kind: input, shape index: {}]   ;;  %s3253_s3 = inlined_call_operand.vmem [shape: f32[2,1,128], index: 3, kind: input, shape index: {}]   ;;  %s3254_s4 = inlined_call_operand.vmem [shape: f32[2,8,32], index: 4, kind: input, shape index: {}]   ;;  %s3255_s5 = inlined_call_operand.vmem [shape: f32[2,8,32], index: 5, kind: input, shape index: {}]   ;;  %s3256_s6 = inlined_call_operand.vmem [shape: f32[64,32], index: 6, kind: output, shape index: {0}]   ;;  %s3257_s7 = inlined_call_operand.hbm [shape: f32[2,8,32], index: 7, kind: output, shape index: {1}]   ;;  %s3258_s8 = inlined_call_operand.hbm [shape: f32[2,8,32], index: 8, kind: output, shape index: {2}]  }
   0x1   :  { %15 = vsyncpa [#allocation5], 0 }
   0x2   :  { %16 = vsyncpa [#allocation8], 0  ;;  %s2690_s27 = smov [#allocation3]  }
   0x3   :  { %s26_s28 = sshll.u32 %s2690_s27, 4  ;;  %s27_s28 = int_to_ptr.vmem [resolvable:$true] %s26_s28 }
   0x4   :  { %s2632_s29 = scalar_lea.vmem %s27_s28, 1024  ;;  %p2637_p1 = scmp.lt.s32.totalorder %s27_s28, %s27_s28 }
   0x5   :  { %p2633_p0 = scmp.ne.s32.totalorder %s27_s28, %s2632_s29  ;;  %p2638_p2 = scmp.lt.s32.totalorder %s2632_s29, %s2632_s29 }
   0x7   :  { %p2639_p3 = por %p2638_p2, %p2637_p1 }
   0x9   :  { %p2640_p4 = pnand %p2639_p3, %p2633_p0 }
   0xb   :  { %2643 = shalt.err (!%p2640_p4)
}
   0xc   :  { %s2691_s30 = smov 128   ;;  %s2692_s9 = smov 8  }
   0xd   :  { %32 = dma.hbm_to_vmem [thread:$0]  %s3252_s2, 1024, %s27_s28, [#allocation4], %s2691_s30, %s2691_s30, %s2692_s9  }
   0xe   :  { %2684 = dma.done.wait [#allocation4], 1024  }
   0xf   :  { %2685 = vsyncadd [#allocation4], 4294966272  ;;  %v2693_v0 = vmov 0.0   ;;  %vm2694_vm0 = vmmov 0   ;;  %v60_v1 = vld [vmem:[%s3251_s1 + $0x18] sm:$0xff]  ;;  %v59_v2 = vld [vmem:[%s3251_s1 + $0x10] sm:$0xff] }
  0x10   :  { %2290 = vmatprep.subr.mxu1 %v2693_v0  ;;  %2298 = vmatprep.mubr.msk.f32.mxu1 %vm2694_vm0, %v2693_v0  ;;  %v2760_v3 = vld [vmem:[#allocation3 + $0x18] sm:$0xff]  ;;  %v2763_v4 = vld [vmem:[#allocation3 + $0x10] sm:$0xff]  ;;  %v58_v5 = vld [vmem:[%s3251_s1 + $0x8] sm:$0xff]  ;;  %vm67_vm1 = vcmask 261120   ;;  %s2695_s27 = smov 64   ;;  %s2696_s10 = smov 32  }
  0x11   :  { %2270 = vmatprep.subr.mxu0 %v60_v1  ;;  %2291 = vmatpush3.msra.mxu1 %v2760_v3  ;;  %v49_v6 = vld [vmem:[%s3250_s0] sm:$0xff]  ;;  %v2773_v7 = vld [vmem:[#allocation3 + $0x8] sm:$0xff]  ;;  %v51_v49 = vld [vmem:[%s3250_s0 + $0x10] sm:$0xff]  ;;  %s2698_s17 = smov [#allocation7]  }
  0x12   :  { %2271 = vmatpush3.msra.mxu0 %v60_v1  ;;  %2292 = vmatprep.subr.mxu1 %v2693_v0  ;;  %v57_v8 = vld [vmem:[%s3251_s1] sm:$0xff]  ;;  %v50_v10 = vld [vmem:[%s3250_s0 + $0x8] sm:$0xff]  ;;  %v52_v50 = vld [vmem:[%s3250_s0 + $0x18] sm:$0xff]  ;;  %s2077_s18 = sshll.u32 %s2698_s17, 4  ;;  %s2078_s18 = int_to_ptr.vmem [resolvable:$true] %s2077_s18 }
  0x13   :  { %2272 = vmatprep.subr.mxu0 %v59_v2  ;;  %2293 = vmatpush3.msra.mxu1 %v2763_v4  ;;  %v2780_v9 = vld [vmem:[#allocation3] sm:$0xff]  ;;  %v54_v52 = vld [vmem:[%s3250_s0 + $0x28] sm:$0xff]  ;;  %v55_v53 = vld [vmem:[%s3250_s0 + $0x30] sm:$0xff]  ;;  %s2644_s19 = scalar_lea.vmem %s2078_s18, 256  ;;  %p2649_p6 = scmp.lt.s32.totalorder %s2078_s18, %s2078_s18 }
  0x14   :  { %2273 = vmatpush3.msra.mxu0 %v59_v2  ;;  %2294 = vmatprep.subr.mxu1 %v2693_v0  ;;  %v47_v11 = vld [vmem:[%s3254_s4] sm:$0xff]  ;;  %v56_v54 = vld [vmem:[%s3250_s0 + $0x38] sm:$0xff]  ;;  %p2645_p5 = scmp.ne.s32.totalorder %s2078_s18, %s2644_s19  ;;  %p2650_p7 = scmp.lt.s32.totalorder %s2644_s19, %s2644_s19 }
  0x15   :  { %2274 = vmatprep.subr.mxu0 %v58_v5  ;;  %2278 = vmatprep.mubr.msk.f32.mxu0 %vm67_vm1, %v49_v6  ;;  %v2816_v14 = vld [vmem:[%s3253_s3] ss:$0 sm:$0xff] }
  0x16   :  { %2275 = vmatpush3.msra.mxu0 %v58_v5  ;;  %2295 = vmatpush3.msra.mxu1 %v2773_v7  ;;  %v48_v20 = vld [vmem:[%s3255_s5] sm:$0xff]  ;;  %p2651_p8 = por %p2650_p7, %p2649_p6 }
  0x17   :  { %2276 = vmatprep.subr.mxu0 %v57_v8  ;;  %2296 = vmatprep.subr.mxu1 %v2693_v0  ;;  %v53_v51 = vld [vmem:[%s3250_s0 + $0x20] sm:$0xff] }
  0x18   :  { %2277 = vmatpush3.msra.mxu0 %v57_v8  ;;  %2297 = vmatpush3.msra.mxu1 %v2780_v9  ;;  %p2652_p9 = pnand %p2651_p8, %p2645_p5 }
  0x19   :  { %2279 = vmatmul.mubr.msk.f32.vlgmr.msra.gmra.mxu0 %vm67_vm1, %v50_v10  ;;  %2299 = vmatmul.mubr.msk.f32.vlgmr.msra.gmra.mxu1 %vm67_vm1, %v47_v11 }
  0x1a   :  { %2301 = vmatprep.subr.mxu1 %v2693_v0  ;;  %2309 = vmatprep.mubr.msk.f32.mxu1 %vm2694_vm0, %v2693_v0 }
  0x1b   :  { %2302 = vmatpush3.msra.mxu1 %v2760_v3  ;;  %2312 = vmatprep.subr.mxu0 %v2693_v0 }
  0x1c   :  { %2303 = vmatprep.subr.mxu1 %v2693_v0  ;;  %2313 = vmatpush3.msra.mxu0 %v2760_v3 }
  0x1d   :  { %2304 = vmatpush3.msra.mxu1 %v2763_v4  ;;  %2314 = vmatprep.subr.mxu0 %v2693_v0 }
  0x1e   :  { %2305 = vmatprep.subr.mxu1 %v2693_v0  ;;  %2315 = vmatpush3.msra.mxu0 %v2763_v4 }
  0x1f   :  { %2306 = vmatpush3.msra.mxu1 %v2773_v7  ;;  %2316 = vmatprep.subr.mxu0 %v2693_v0 }
  0x20   :  { %2307 = vmatprep.subr.mxu1 %v2693_v0  ;;  %2317 = vmatpush3.msra.mxu0 %v2773_v7 }
  0x21   :  { %2308 = vmatpush3.msra.mxu1 %v2780_v9  ;;  %2318 = vmatprep.subr.mxu0 %v2693_v0 }
  0x22   :  { %2319 = vmatpush3.msra.mxu0 %v2780_v9  ;;  %2323 = vmatprep.subr.mxu1 %v2693_v0 }
  0x23   :  { %2334 = vmatprep.subr.mxu0 %v2693_v0  ;;  %2281 = vmatprep.mubr.msk.f32.mxu0 %vm67_vm1, %v51_v49 }
  0x24   :  { %2282 = vmatmul.mubr.msk.f32.gmra.mxu0 %vm67_vm1, %v52_v50 }
  0x25   :  { %2284 = vmatprep.mubr.msk.f32.mxu0 %vm67_vm1, %v53_v51 }
  0x28   :  { %2285 = vmatmul.mubr.msk.f32.gmra.mxu0 %vm67_vm1, %v54_v52 }
  0x29   :  { %2287 = vmatprep.mubr.msk.f32.mxu0 %vm67_vm1, %v55_v53 }
  0x2c   :  { %2288 = vmatmul.mubr.msk.f32.gmra.mxu0 %vm67_vm1, %v56_v54 }
  0x2d   :  { %2320 = vmatprep.mubr.msk.f32.mxu0 %vm2694_vm0, %v2693_v0 }
  0xd9   :  { %v2280_v12 = vpop.f32.mrf.mxu0  ;;  %v275_v13 = vpop.f32.mrf.mxu1 }
  0xda   :  { %v164_v35 = vadd.f32 %v2280_v12, %v2816_v14 }
  0xdb   :  { %v158_v15 = vpop.f32.mrf.mxu0  ;;  %v2300_v16 = vpop.f32.mrf.mxu1 }
  0xdc   :  { %v159_v17 = vadd.f32 %v2816_v14, %v158_v15 }
  0xde   :  { %v279_v18 = vadd.f32 %v275_v13, %v159_v17 }
  0xe0   :  { %2496 = vtanh.f32 %v279_v18  ;;  %v2105_v21 = vmul.f32 -1.442695, %v279_v18 }
  0xe2   :  { %2498 = vpow2.f32 %v2105_v21 }
  0xe4   :  { %v2283_v59 = vpop.f32.mrf.mxu0 }
  0xe6   :  { %v168_v60 = vpop.f32.mrf.mxu0 }
  0xe7   :  { %v169_v2 = vadd.f32 %v2816_v14, %v168_v60 }
  0xe8   :  { %v2888_v61 = vpop.f32.mrf.mxu0 }
  0xea   :  { %v2890_v62 = vpop.f32.mrf.mxu0 }
  0xec   :  { %v2892_v63 = vpop.f32.mrf.mxu0 }
  0xed   :  { %v2497_v19 = vpop.eup %2496 }
  0xee   :  { %293 = vrot.lane.b32.xlu0 %v2497_v19, %s2695_s27  ;;  %v2894_v1 = vpop.f32.mrf.mxu0 }
  0xef   :  { %v2499_v22 = vpop.eup %2498 }
  0xf0   :  { %v283_v23 = vadd.f32 1.0, %v2499_v22 }
  0xf2   :  { %288 = vrot.lane.b32.xlu0 %v48_v20, %s2696_s10  ;;  %2500 = vrcp.f32 %v283_v23 }
  0xff   :  { %v2501_v24 = vpop.eup %2500 }
 0x160   :  { %v294_v25 = vpop.permute.xlu0 %293 }
 0x161   :  { %v296_v26 = vmul.f32 %v2501_v24, %v294_v25  ;;  %v174_v25 = vadd.f32 %v2283_v59, %v2816_v14 }
 0x163   :  { %298 = vrot.lane.b32.xlu1 %v296_v26, %s2696_s10 }
 0x164   :  { %v289_v27 = vpop.permute.xlu0 %288 }
 0x165   :  { %v291_v28 = vmul.f32 %v2501_v24, %v289_v27 }
 0x1d5   :  { %v299_v29 = vpop.permute.xlu1 %298 }
 0x1d6   :  { %v301_v30 = vadd.f32 %v299_v29, %v291_v28 }
 0x1d8   :  { %2502 = vtanh.f32 %v301_v30 }
 0x1e5   :  { %v2503_v31 = vpop.eup %2502 }
 0x1e6   :  { %304 = vrot.lane.b32.xlu1 %v2503_v31, %s2695_s27 }
 0x258   :  { %v305_v32 = vpop.permute.xlu1 %304 }
 0x259   :  { %v307_v33 = vmul.f32 %v2501_v24, %v305_v32 }
 0x25b   :  { %309 = vrot.lane.b32.xlu0 %v307_v33, %s2696_s10 }
 0x2cd   :  { %v310_v34 = vpop.permute.xlu0 %309 }
 0x2ce   :  { %312 = vst.msk [vmem:[%s3256_s6] sm:$0xff] %vm67_vm1, %v310_v34  ;;  %2310 = vmatmul.mubr.msk.f32.vlgmr.msra.gmra.mxu1 %vm67_vm1, %v310_v34 }
 0x2cf   :  { %2324 = vmatpush3.msra.mxu1 %v2760_v3  ;;  %2331 = vmatprep.mubr.msk.f32.mxu1 %vm2694_vm0, %v2693_v0 }
 0x2d0   :  { %2325 = vmatprep.subr.mxu1 %v2693_v0 }
 0x2d1   :  { %2326 = vmatpush3.msra.mxu1 %v2763_v4 }
 0x2d2   :  { %2327 = vmatprep.subr.mxu1 %v2693_v0 }
 0x2d3   :  { %2328 = vmatpush3.msra.mxu1 %v2773_v7 }
 0x2d4   :  { %2329 = vmatprep.subr.mxu1 %v2693_v0 }
 0x2d5   :  { %2330 = vmatpush3.msra.mxu1 %v2780_v9 }
 0x2d6   :  { %2345 = vmatprep.subr.mxu1 %v2693_v0 }
 0x38e   :  { %v383_v36 = vpop.f32.mrf.mxu1 }
 0x38f   :  { %v387_v37 = vadd.f32 %v383_v36, %v164_v35 }
 0x390   :  { %v2311_v38 = vpop.f32.mrf.mxu1 }
 0x391   :  { %2504 = vtanh.f32 %v387_v37  ;;  %v2107_v40 = vmul.f32 -1.442695, %v387_v37 }
 0x393   :  { %2506 = vpow2.f32 %v2107_v40 }
 0x39e   :  { %v2505_v39 = vpop.eup %2504 }
 0x39f   :  { %397 = vrot.lane.b32.xlu1 %v2505_v39, %s2695_s27 }
 0x3a0   :  { %v2507_v41 = vpop.eup %2506 }
 0x3a1   :  { %v391_v42 = vadd.f32 1.0, %v2507_v41 }
 0x3a3   :  { %2508 = vrcp.f32 %v391_v42 }
 0x3b0   :  { %v2509_v43 = vpop.eup %2508 }
 0x3b1   :  { %v395_v46 = vmul.f32 %v2509_v43, %v301_v30 }
 0x411   :  { %v398_v44 = vpop.permute.xlu1 %397 }
 0x412   :  { %v400_v45 = vmul.f32 %v2509_v43, %v398_v44 }
 0x414   :  { %402 = vrot.lane.b32.xlu0 %v400_v45, %s2696_s10 }
 0x486   :  { %v403_v47 = vpop.permute.xlu0 %402 }
 0x487   :  { %v405_v48 = vadd.f32 %v403_v47, %v395_v46 }
 0x489   :  { %2510 = vtanh.f32 %v405_v48 }
 0x496   :  { %v2511_v55 = vpop.eup %2510 }
 0x497   :  { %408 = vrot.lane.b32.xlu1 %v2511_v55, %s2695_s27 }
 0x509   :  { %v409_v56 = vpop.permute.xlu1 %408 }
 0x50a   :  { %v411_v57 = vmul.f32 %v2509_v43, %v409_v56  ;;  %v179_v43 = vadd.f32 %v2816_v14, %v2890_v62 }
 0x50c   :  { %413 = vrot.lane.b32.xlu0 %v411_v57, %s2696_s10 }
 0x57e   :  { %v414_v58 = vpop.permute.xlu0 %413 }
 0x57f   :  { %2108 = vst.msk [vmem:[%s3256_s6 + $0x8] sm:$0xff] %vm67_vm1, %v414_v58  ;;  %2321 = vmatmul.mubr.msk.f32.vlgmr.msra.gmra.mxu0 %vm67_vm1, %v414_v58 }
 0x580   :  { %2335 = vmatpush3.msra.mxu0 %v2760_v3  ;;  %2342 = vmatprep.mubr.msk.f32.mxu0 %vm2694_vm0, %v2693_v0 }
 0x581   :  { %2336 = vmatprep.subr.mxu0 %v2693_v0 }
 0x582   :  { %2337 = vmatpush3.msra.mxu0 %v2763_v4 }
 0x583   :  { %2338 = vmatprep.subr.mxu0 %v2693_v0 }
 0x584   :  { %2339 = vmatpush3.msra.mxu0 %v2773_v7 }
 0x585   :  { %2340 = vmatprep.subr.mxu0 %v2693_v0 }
 0x586   :  { %2341 = vmatpush3.msra.mxu0 %v2780_v9 }
 0x587   :  { %2356 = vmatprep.subr.mxu0 %v2693_v0 }
 0x63f   :  { %v488_v5 = vpop.f32.mrf.mxu0 }
 0x640   :  { %v492_v6 = vadd.f32 %v488_v5, %v169_v2 }
 0x641   :  { %v2322_v8 = vpop.f32.mrf.mxu0 }
 0x642   :  { %2512 = vtanh.f32 %v492_v6  ;;  %v2110_v11 = vmul.f32 -1.442695, %v492_v6 }
 0x644   :  { %2514 = vpow2.f32 %v2110_v11 }
 0x64f   :  { %v2513_v10 = vpop.eup %2512 }
 0x650   :  { %502 = vrot.lane.b32.xlu1 %v2513_v10, %s2695_s27 }
 0x651   :  { %v2515_v12 = vpop.eup %2514 }
 0x652   :  { %v496_v13 = vadd.f32 1.0, %v2515_v12 }
 0x654   :  { %2516 = vrcp.f32 %v496_v13 }
 0x661   :  { %v2517_v15 = vpop.eup %2516 }
 0x662   :  { %v500_v18 = vmul.f32 %v2517_v15, %v405_v48 }
 0x6c2   :  { %v503_v16 = vpop.permute.xlu1 %502 }
 0x6c3   :  { %v505_v17 = vmul.f32 %v2517_v15, %v503_v16 }
 0x6c5   :  { %507 = vrot.lane.b32.xlu0 %v505_v17, %s2696_s10 }
 0x737   :  { %v508_v19 = vpop.permute.xlu0 %507 }
 0x738   :  { %v510_v20 = vadd.f32 %v508_v19, %v500_v18 }
 0x73a   :  { %2518 = vtanh.f32 %v510_v20 }
 0x747   :  { %v2519_v21 = vpop.eup %2518 }
 0x748   :  { %513 = vrot.lane.b32.xlu1 %v2519_v21, %s2695_s27  ;;  %v1065_v21 = vld [vmem:[%s3256_s6] sm:$0xff] }
 0x7ba   :  { %v514_v22 = vpop.permute.xlu1 %513 }
 0x7bb   :  { %v516_v23 = vmul.f32 %v2517_v15, %v514_v22  ;;  %v2133_v15 = vld [vmem:[%s3251_s1 + $0x38] sm:$0xff]  ;;  %v2131_v22 = vld [vmem:[%s3251_s1 + $0x28] sm:$0xff] }
 0x7bd   :  { %518 = vrot.lane.b32.xlu0 %v516_v23, %s2696_s10  ;;  %v2130_v23 = vld [vmem:[%s3251_s1 + $0x20] sm:$0xff] }
 0x82f   :  { %v519_v24 = vpop.permute.xlu0 %518 }
 0x830   :  { %2111 = vst.msk [vmem:[%s3256_s6 + $0x10] sm:$0xff] %vm67_vm1, %v519_v24  ;;  %2332 = vmatmul.mubr.msk.f32.vlgmr.msra.gmra.mxu1 %vm67_vm1, %v519_v24  ;;  %v1066_v24 = vld [vmem:[%s3256_s6 + $0x8] sm:$0xff] }
 0x831   :  { %2346 = vmatpush3.msra.mxu1 %v2760_v3  ;;  %2353 = vmatprep.mubr.msk.f32.mxu1 %vm2694_vm0, %v2693_v0 }
 0x832   :  { %2347 = vmatprep.subr.mxu1 %v2693_v0 }
 0x833   :  { %2348 = vmatpush3.msra.mxu1 %v2763_v4 }
 0x834   :  { %2349 = vmatprep.subr.mxu1 %v2693_v0 }
 0x835   :  { %2350 = vmatpush3.msra.mxu1 %v2773_v7 }
 0x836   :  { %2351 = vmatprep.subr.mxu1 %v2693_v0 }
 0x837   :  { %2352 = vmatpush3.msra.mxu1 %v2780_v9 }
 0x838   :  { %2367 = vmatprep.subr.mxu1 %v2693_v0 }
 0x8f0   :  { %v593_v26 = vpop.f32.mrf.mxu1 }
 0x8f1   :  { %v597_v27 = vadd.f32 %v593_v26, %v174_v25  ;;  %v1067_v25 = vld [vmem:[%s3256_s6 + $0x10] sm:$0xff] }
 0x8f2   :  { %v2333_v28 = vpop.f32.mrf.mxu1 }
 0x8f3   :  { %2520 = vtanh.f32 %v597_v27  ;;  %v2113_v30 = vmul.f32 -1.442695, %v597_v27 }
 0x8f5   :  { %2522 = vpow2.f32 %v2113_v30 }
 0x900   :  { %v2521_v29 = vpop.eup %2520 }
 0x901   :  { %607 = vrot.lane.b32.xlu1 %v2521_v29, %s2695_s27  ;;  %v189_v29 = vadd.f32 %v2816_v14, %v2894_v1 }
 0x902   :  { %v2523_v31 = vpop.eup %2522 }
 0x903   :  { %v601_v32 = vadd.f32 1.0, %v2523_v31 }
 0x905   :  { %2524 = vrcp.f32 %v601_v32 }
 0x912   :  { %v2525_v33 = vpop.eup %2524 }
 0x913   :  { %v605_v36 = vmul.f32 %v2525_v33, %v510_v20  ;;  %v2132_v20 = vld [vmem:[%s3251_s1 + $0x30] sm:$0xff] }
 0x973   :  { %v608_v34 = vpop.permute.xlu1 %607 }
 0x974   :  { %v610_v35 = vmul.f32 %v2525_v33, %v608_v34 }
 0x976   :  { %612 = vrot.lane.b32.xlu0 %v610_v35, %s2696_s10 }
 0x9e8   :  { %v613_v37 = vpop.permute.xlu0 %612 }
 0x9e9   :  { %v615_v38 = vadd.f32 %v613_v37, %v605_v36 }
 0x9eb   :  { %2526 = vtanh.f32 %v615_v38 }
 0x9f8   :  { %v2527_v39 = vpop.eup %2526 }
 0x9f9   :  { %618 = vrot.lane.b32.xlu1 %v2527_v39, %s2695_s27 }
 0xa6b   :  { %v619_v40 = vpop.permute.xlu1 %618 }
 0xa6c   :  { %v621_v41 = vmul.f32 %v2525_v33, %v619_v40 }
 0xa6e   :  { %623 = vrot.lane.b32.xlu0 %v621_v41, %s2696_s10 }
 0xae0   :  { %v624_v42 = vpop.permute.xlu0 %623 }
 0xae1   :  { %2114 = vst.msk [vmem:[%s3256_s6 + $0x18] sm:$0xff] %vm67_vm1, %v624_v42  ;;  %2343 = vmatmul.mubr.msk.f32.vlgmr.msra.gmra.mxu0 %vm67_vm1, %v624_v42 }
 0xae2   :  { %2357 = vmatpush3.msra.mxu0 %v2760_v3  ;;  %2364 = vmatprep.mubr.msk.f32.mxu0 %vm2694_vm0, %v2693_v0 }
 0xae3   :  { %2358 = vmatprep.subr.mxu0 %v2693_v0 }
 0xae4   :  { %2359 = vmatpush3.msra.mxu0 %v2763_v4 }
 0xae5   :  { %2360 = vmatprep.subr.mxu0 %v2693_v0 }
 0xae6   :  { %2361 = vmatpush3.msra.mxu0 %v2773_v7 }
 0xae7   :  { %2362 = vmatprep.subr.mxu0 %v2693_v0 }
 0xae8   :  { %2363 = vmatpush3.msra.mxu0 %v2780_v9  ;;  %v1068_v26 = vld [vmem:[%s3256_s6 + $0x18] sm:$0xff] }
 0xae9   :  { %2378 = vmatprep.subr.mxu0 %v2133_v15 }
 0xba1   :  { %v698_v44 = vpop.f32.mrf.mxu0 }
 0xba2   :  { %v702_v45 = vadd.f32 %v698_v44, %v179_v43  ;;  %v3012_v43 = vld [vmem:[#allocation3 + $0x38] sm:$0xff]  ;;  %v3015_v44 = vld [vmem:[#allocation3 + $0x30] sm:$0xff] }
 0xba3   :  { %v2344_v46 = vpop.f32.mrf.mxu0 }
 0xba4   :  { %2528 = vtanh.f32 %v702_v45  ;;  %v2116_v48 = vmul.f32 -1.442695, %v702_v45  ;;  %v3019_v45 = vld [vmem:[#allocation3 + $0x28] sm:$0xff]  ;;  %v3023_v46 = vld [vmem:[#allocation3 + $0x20] sm:$0xff] }
 0xba6   :  { %2530 = vpow2.f32 %v2116_v48 }
 0xbb1   :  { %v2529_v47 = vpop.eup %2528 }
 0xbb2   :  { %712 = vrot.lane.b32.xlu1 %v2529_v47, %s2695_s27 }
 0xbb3   :  { %v2531_v49 = vpop.eup %2530 }
 0xbb4   :  { %v706_v50 = vadd.f32 1.0, %v2531_v49  ;;  %v2129_v49 = vld [vmem:[%s3255_s5 + $0x8] sm:$0xff]  ;;  %s2697_s5 = smov 96  }
 0xbb6   :  { %2532 = vrcp.f32 %v706_v50 }
 0xbc3   :  { %v2533_v51 = vpop.eup %2532 }
 0xbc4   :  { %v710_v54 = vmul.f32 %v2533_v51, %v615_v38 }
 0xc24   :  { %v713_v52 = vpop.permute.xlu1 %712 }
 0xc25   :  { %v715_v53 = vmul.f32 %v2533_v51, %v713_v52 }
 0xc27   :  { %717 = vrot.lane.b32.xlu0 %v715_v53, %s2696_s10  ;;  %v194_v53 = vadd.f32 %v2892_v63, %v2816_v14 }
 0xc99   :  { %v718_v55 = vpop.permute.xlu0 %717 }
 0xc9a   :  { %v720_v56 = vadd.f32 %v718_v55, %v710_v54 }
 0xc9c   :  { %2534 = vtanh.f32 %v720_v56 }
 0xca9   :  { %v2535_v57 = vpop.eup %2534 }
 0xcaa   :  { %723 = vrot.lane.b32.xlu1 %v2535_v57, %s2695_s27 }
 0xd1c   :  { %v724_v58 = vpop.permute.xlu1 %723 }
 0xd1d   :  { %v726_v59 = vmul.f32 %v2533_v51, %v724_v58  ;;  %v2128_v51 = vld [vmem:[%s3254_s4 + $0x8] sm:$0xff] }
 0xd1f   :  { %728 = vrot.lane.b32.xlu0 %v726_v59, %s2696_s10  ;;  %v3073_v59 = vld [vmem:[%s3253_s3 + $0x1] ss:$0 sm:$0xff] }
 0xd91   :  { %v729_v60 = vpop.permute.xlu0 %728 }
 0xd92   :  { %2117 = vst.msk [vmem:[%s3256_s6 + $0x20] sm:$0xff] %vm67_vm1, %v729_v60  ;;  %2354 = vmatmul.mubr.msk.f32.vlgmr.msra.gmra.mxu1 %vm67_vm1, %v729_v60 }
 0xd93   :  { %2368 = vmatpush3.msra.mxu1 %v2760_v3  ;;  %2375 = vmatprep.mubr.msk.f32.mxu1 %vm2694_vm0, %v2693_v0  ;;  %v184_v3 = vadd.f32 %v2888_v61, %v2816_v14 }
 0xd94   :  { %2369 = vmatprep.subr.mxu1 %v2693_v0 }
 0xd95   :  { %2370 = vmatpush3.msra.mxu1 %v2763_v4 }
 0xd96   :  { %2371 = vmatprep.subr.mxu1 %v2693_v0 }
 0xd97   :  { %2372 = vmatpush3.msra.mxu1 %v2773_v7 }
 0xd98   :  { %2373 = vmatprep.subr.mxu1 %v2693_v0 }
 0xd99   :  { %2374 = vmatpush3.msra.mxu1 %v2780_v9  ;;  %v1069_v27 = vld [vmem:[%s3256_s6 + $0x20] sm:$0xff] }
 0xd9a   :  { %2398 = vmatprep.subr.mxu1 %v2693_v0 }
 0xe52   :  { %v803_v62 = vpop.f32.mrf.mxu1 }
 0xe53   :  { %v807_v2 = vadd.f32 %v803_v62, %v184_v3 }
 0xe54   :  { %v2355_v5 = vpop.f32.mrf.mxu1 }
 0xe55   :  { %2536 = vtanh.f32 %v807_v2  ;;  %v2119_v4 = vmul.f32 -1.442695, %v807_v2 }
 0xe57   :  { %2538 = vpow2.f32 %v2119_v4 }
 0xe62   :  { %v2537_v6 = vpop.eup %2536 }
 0xe63   :  { %817 = vrot.lane.b32.xlu1 %v2537_v6, %s2695_s27 }
 0xe64   :  { %v2539_v8 = vpop.eup %2538 }
 0xe65   :  { %v811_v7 = vadd.f32 1.0, %v2539_v8 }
 0xe67   :  { %2540 = vrcp.f32 %v811_v7 }
 0xe74   :  { %v2541_v10 = vpop.eup %2540 }
 0xe75   :  { %v815_v12 = vmul.f32 %v2541_v10, %v720_v56 }
 0xed5   :  { %v818_v11 = vpop.permute.xlu1 %817 }
 0xed6   :  { %v820_v9 = vmul.f32 %v2541_v10, %v818_v11 }
 0xed8   :  { %822 = vrot.lane.b32.xlu0 %v820_v9, %s2696_s10 }
 0xf4a   :  { %v823_v13 = vpop.permute.xlu0 %822 }
 0xf4b   :  { %v825_v61 = vadd.f32 %v823_v13, %v815_v12 }
 0xf4d   :  { %2542 = vtanh.f32 %v825_v61 }
 0xf5a   :  { %v2543_v16 = vpop.eup %2542 }
 0xf5b   :  { %828 = vrot.lane.b32.xlu1 %v2543_v16, %s2695_s27 }
 0xfcd   :  { %v829_v17 = vpop.permute.xlu1 %828 }
 0xfce   :  { %v831_v18 = vmul.f32 %v2541_v10, %v829_v17 }
 0xfd0   :  { %833 = vrot.lane.b32.xlu0 %v831_v18, %s2696_s10 }
0x1042   :  { %v834_v19 = vpop.permute.xlu0 %833 }
0x1043   :  { %2120 = vst.msk [vmem:[%s3256_s6 + $0x28] sm:$0xff] %vm67_vm1, %v834_v19  ;;  %2365 = vmatmul.mubr.msk.f32.vlgmr.msra.gmra.mxu0 %vm67_vm1, %v834_v19 }
0x1044   :  { %2379 = vmatpush3.msra.mxu0 %v2133_v15  ;;  %2386 = vmatprep.mubr.msk.f32.mxu0 %vm67_vm1, %v1065_v21 }
0x1045   :  { %2380 = vmatprep.subr.mxu0 %v2132_v20 }
0x1046   :  { %2381 = vmatpush3.msra.mxu0 %v2132_v20 }
0x1047   :  { %2382 = vmatprep.subr.mxu0 %v2131_v22 }
0x1048   :  { %2383 = vmatpush3.msra.mxu0 %v2131_v22 }
0x1049   :  { %2384 = vmatprep.subr.mxu0 %v2130_v23 }
0x104a   :  { %2385 = vmatpush3.msra.mxu0 %v2130_v23  ;;  %v1070_v28 = vld [vmem:[%s3256_s6 + $0x28] sm:$0xff] }
0x104b   :  { %2387 = vmatmul.mubr.msk.f32.vlgmr.msra.gmra.mxu0 %vm67_vm1, %v1066_v24  ;;  %2420 = vmatprep.subr.mxu0 %v2693_v0 }
0x104c   :  { %2389 = vmatprep.mubr.msk.f32.mxu0 %vm67_vm1, %v1067_v25  ;;  %2421 = vmatpush3.msra.mxu0 %v3012_v43 }
0x104d   :  { %2422 = vmatprep.subr.mxu0 %v2693_v0 }
0x104e   :  { %2423 = vmatpush3.msra.mxu0 %v3015_v44 }
0x104f   :  { %2390 = vmatmul.mubr.msk.f32.gmra.mxu0 %vm67_vm1, %v1068_v26  ;;  %2424 = vmatprep.subr.mxu0 %v2693_v0 }
0x1050   :  { %2392 = vmatprep.mubr.msk.f32.mxu0 %vm67_vm1, %v1069_v27  ;;  %2425 = vmatpush3.msra.mxu0 %v3019_v45 }
0x1051   :  { %2426 = vmatprep.subr.mxu0 %v2693_v0 }
0x1052   :  { %2427 = vmatpush3.msra.mxu0 %v3023_v46 }
0x1053   :  { %2393 = vmatmul.mubr.msk.f32.gmra.mxu0 %vm67_vm1, %v1070_v28  ;;  %2442 = vmatprep.subr.mxu0 %v2693_v0 }
0x1103   :  { %v908_v30 = vpop.f32.mrf.mxu0 }
0x1104   :  { %v912_v31 = vadd.f32 %v908_v30, %v189_v29 }
0x1105   :  { %v2366_v32 = vpop.f32.mrf.mxu0 }
0x1106   :  { %2544 = vtanh.f32 %v912_v31  ;;  %v2122_v34 = vmul.f32 -1.442695, %v912_v31 }
0x1108   :  { %2546 = vpow2.f32 %v2122_v34 }
0x110b   :  { %v3068_v54 = vpop.f32.mrf.mxu0 }
0x110c   :  { %v1180_v30 = vadd.f32 %v3068_v54, %v3073_v59 }
0x110d   :  { %v1174_v58 = vpop.f32.mrf.mxu0 }
0x110e   :  { %v1175_v60 = vadd.f32 %v3073_v59, %v1174_v58 }
0x1113   :  { %v2545_v33 = vpop.eup %2544 }
0x1114   :  { %922 = vrot.lane.b32.xlu1 %v2545_v33, %s2695_s27 }
0x1115   :  { %v2547_v35 = vpop.eup %2546 }
0x1116   :  { %v916_v36 = vadd.f32 1.0, %v2547_v35 }
0x1118   :  { %2548 = vrcp.f32 %v916_v36 }
0x1125   :  { %v2549_v37 = vpop.eup %2548 }
0x1126   :  { %v920_v40 = vmul.f32 %v2549_v37, %v825_v61 }
0x1186   :  { %v923_v38 = vpop.permute.xlu1 %922 }
0x1187   :  { %v925_v39 = vmul.f32 %v2549_v37, %v923_v38 }
0x1189   :  { %927 = vrot.lane.b32.xlu0 %v925_v39, %s2696_s10 }
0x11fb   :  { %v928_v41 = vpop.permute.xlu0 %927 }
0x11fc   :  { %v3008_v1 = vadd.f32 %v928_v41, %v920_v40 }
0x11fe   :  { %2550 = vtanh.f32 %v3008_v1 }
0x120b   :  { %v2551_v42 = vpop.eup %2550 }
0x120c   :  { %933 = vrot.lane.b32.xlu1 %v2551_v42, %s2695_s27 }
0x127e   :  { %v934_v47 = vpop.permute.xlu1 %933 }
0x127f   :  { %v936_v48 = vmul.f32 %v2549_v37, %v934_v47 }
0x1281   :  { %938 = vrot.lane.b32.xlu0 %v936_v48, %s2696_s10 }
0x1285   :  { %1304 = vrot.lane.b32.xlu0 %v2129_v49, %s2696_s10 }
0x12f3   :  { %v939_v50 = vpop.permute.xlu0 %938 }
0x12f4   :  { %2123 = vst.msk [vmem:[%s3256_s6 + $0x30] sm:$0xff] %vm67_vm1, %v939_v50  ;;  %2376 = vmatmul.mubr.msk.f32.vlgmr.msra.gmra.mxu1 %vm67_vm1, %v939_v50 }
0x12f5   :  { %2399 = vmatpush3.msra.mxu1 %v3012_v43  ;;  %2406 = vmatprep.mubr.msk.f32.mxu1 %vm2694_vm0, %v2693_v0 }
0x12f6   :  { %2400 = vmatprep.subr.mxu1 %v2693_v0 }
0x12f7   :  { %2401 = vmatpush3.msra.mxu1 %v3015_v44  ;;  %v1305_v10 = vpop.permute.xlu0 %1304 }
0x12f8   :  { %2402 = vmatprep.subr.mxu1 %v2693_v0 }
0x12f9   :  { %2403 = vmatpush3.msra.mxu1 %v3019_v45 }
0x12fa   :  { %2404 = vmatprep.subr.mxu1 %v2693_v0 }
0x12fb   :  { %2405 = vmatpush3.msra.mxu1 %v3023_v46  ;;  %v1071_v52 = vld [vmem:[%s3256_s6 + $0x30] sm:$0xff] }
0x12fc   :  { %2407 = vmatmul.mubr.msk.f32.vlgmr.msra.gmra.mxu1 %vm67_vm1, %v2128_v51  ;;  %2395 = vmatprep.mubr.msk.f32.mxu0 %vm67_vm1, %v1071_v52 }
0x12fd   :  { %2409 = vmatprep.subr.mxu1 %v2693_v0  ;;  %2417 = vmatprep.mubr.msk.f32.mxu1 %vm2694_vm0, %v2693_v0 }
0x12fe   :  { %2410 = vmatpush3.msra.mxu1 %v3012_v43 }
0x12ff   :  { %2411 = vmatprep.subr.mxu1 %v2693_v0 }
0x1300   :  { %2412 = vmatpush3.msra.mxu1 %v3015_v44 }
0x1301   :  { %2413 = vmatprep.subr.mxu1 %v2693_v0 }
0x1302   :  { %2414 = vmatpush3.msra.mxu1 %v3019_v45 }
0x1303   :  { %2415 = vmatprep.subr.mxu1 %v2693_v0 }
0x1304   :  { %2416 = vmatpush3.msra.mxu1 %v3023_v46 }
0x1305   :  { %2431 = vmatprep.subr.mxu1 %v2693_v0 }
0x13b4   :  { %v1013_v55 = vpop.f32.mrf.mxu1 }
0x13b5   :  { %v1017_v56 = vadd.f32 %v1013_v55, %v194_v53  ;;  %v2391_v53 = vpop.f32.mrf.mxu0 }
0x13b6   :  { %v2377_v57 = vpop.f32.mrf.mxu1 }
0x13b7   :  { %v2125_v15 = vmul.f32 -1.442695, %v1017_v56  ;;  %v1184_v54 = vpop.f32.mrf.mxu0 }
0x13b9   :  { %v3135_v55 = vpop.f32.mrf.mxu0 }
0x13bc   :  { %v1291_v3 = vpop.f32.mrf.mxu1 }
0x13bd   :  { %v1295_v62 = vadd.f32 %v1291_v3, %v1175_v60  ;;  %v1185_v60 = vadd.f32 %v3073_v59, %v1184_v54 }
0x13be   :  { %v2408_v2 = vpop.f32.mrf.mxu1 }
0x13bf   :  { %2552 = vtanh.f32 %v1295_v62  ;;  %v2144_v14 = vmul.f32 -1.442695, %v1295_v62 }
0x13c1   :  { %2554 = vpow2.f32 %v2144_v14 }
0x13cc   :  { %v2553_v5 = vpop.eup %2552 }
0x13cd   :  { %1309 = vrot.lane.b32.xlu1 %v2553_v5, %s2695_s27 }
0x13ce   :  { %v2555_v63 = vpop.eup %2554 }
0x13cf   :  { %v1299_v6 = vadd.f32 1.0, %v2555_v63 }
0x13d1   :  { %2556 = vrcp.f32 %v1299_v6 }
0x13de   :  { %v2557_v4 = vpop.eup %2556 }
0x13df   :  { %v1307_v11 = vmul.f32 %v2557_v4, %v1305_v10 }
0x143f   :  { %v1310_v8 = vpop.permute.xlu1 %1309 }
0x1440   :  { %v1312_v7 = vmul.f32 %v2557_v4, %v1310_v8 }
0x1442   :  { %1314 = vrot.lane.b32.xlu1 %v1312_v7, %s2696_s10 }
0x14b4   :  { %v1315_v9 = vpop.permute.xlu1 %1314 }
0x14b5   :  { %v1317_v12 = vadd.f32 %v1315_v9, %v1307_v11 }
0x14b7   :  { %2558 = vtanh.f32 %v1317_v12 }
0x14b8   :  { %2560 = vtanh.f32 %v1017_v56  ;;  %v3137_v56 = vpop.f32.mrf.mxu0 }
0x14b9   :  { %2562 = vpow2.f32 %v2125_v15 }
0x14c4   :  { %v2559_v13 = vpop.eup %2558 }
0x14c5   :  { %1320 = vrot.lane.b32.xlu0 %v2559_v13, %s2695_s27  ;;  %v2561_v61 = vpop.eup %2560 }
0x14c6   :  { %v2563_v16 = vpop.eup %2562 }
0x14c7   :  { %v1021_v17 = vadd.f32 1.0, %v2563_v16  ;;  %v1190_v16 = vadd.f32 %v2391_v53, %v3073_v59 }
0x14c9   :  { %1027 = vrot.lane.b32.xlu0 %v2561_v61, %s2695_s27  ;;  %2564 = vrcp.f32 %v1021_v17 }
0x14d6   :  { %v2565_v20 = vpop.eup %2564 }
0x14d7   :  { %v1025_v24 = vmul.f32 %v2565_v20, %v3008_v1 }
0x1537   :  { %v1321_v18 = vpop.permute.xlu0 %1320 }
0x1538   :  { %v1323_v19 = vmul.f32 %v2557_v4, %v1321_v18 }
0x153a   :  { %1325 = vrot.lane.b32.xlu1 %v1323_v19, %s2696_s10 }
0x153b   :  { %v1028_v21 = vpop.permute.xlu0 %1027 }
0x153c   :  { %v1030_v22 = vmul.f32 %v2565_v20, %v1028_v21 }
0x153e   :  { %1032 = vrot.lane.b32.xlu0 %v1030_v22, %s2696_s10 }
0x15ac   :  { %v1326_v23 = vpop.permute.xlu1 %1325 }
0x15ad   :  { %1328 = vst.msk [vmem:[%s3256_s6] sm:$0xff] %vm67_vm1, %v1326_v23  ;;  %2418 = vmatmul.mubr.msk.f32.vlgmr.msra.gmra.mxu1 %vm67_vm1, %v1326_v23 }
0x15ae   :  { %2432 = vmatpush3.msra.mxu1 %v3012_v43  ;;  %2439 = vmatprep.mubr.msk.f32.mxu1 %vm2694_vm0, %v2693_v0 }
0x15af   :  { %2433 = vmatprep.subr.mxu1 %v2693_v0 }
0x15b0   :  { %v1033_v25 = vpop.permute.xlu0 %1032  ;;  %2434 = vmatpush3.msra.mxu1 %v3015_v44 }
0x15b1   :  { %v3093_v26 = vadd.f32 %v1033_v25, %v1025_v24  ;;  %2435 = vmatprep.subr.mxu1 %v2693_v0 }
0x15b2   :  { %2436 = vmatpush3.msra.mxu1 %v3019_v45 }
0x15b3   :  { %2566 = vtanh.f32 %v3093_v26  ;;  %2437 = vmatprep.subr.mxu1 %v2693_v0 }
0x15b4   :  { %2438 = vmatpush3.msra.mxu1 %v3023_v46 }
0x15b5   :  { %2453 = vmatprep.subr.mxu1 %v2693_v0 }
0x15c0   :  { %v2567_v27 = vpop.eup %2566 }
0x15c1   :  { %1038 = vrot.lane.b32.xlu0 %v2567_v27, %s2695_s27 }
0x1633   :  { %v1039_v28 = vpop.permute.xlu0 %1038 }
0x1634   :  { %v1041_v29 = vmul.f32 %v2565_v20, %v1039_v28 }
0x1636   :  { %1043 = vrot.lane.b32.xlu0 %v1041_v29, %s2696_s10 }
0x166d   :  { %v1398_v31 = vpop.f32.mrf.mxu1 }
0x166e   :  { %v1402_v32 = vadd.f32 %v1398_v31, %v1180_v30 }
0x166f   :  { %v2419_v33 = vpop.f32.mrf.mxu1 }
0x1670   :  { %2568 = vtanh.f32 %v1402_v32  ;;  %v2146_v37 = vmul.f32 -1.442695, %v1402_v32 }
0x1672   :  { %2570 = vpow2.f32 %v2146_v37 }
0x167d   :  { %v2569_v34 = vpop.eup %2568 }
0x167e   :  { %1412 = vrot.lane.b32.xlu1 %v2569_v34, %s2695_s27 }
0x167f   :  { %v2571_v38 = vpop.eup %2570 }
0x1680   :  { %v1406_v39 = vadd.f32 1.0, %v2571_v38 }
0x1682   :  { %2572 = vrcp.f32 %v1406_v39 }
0x168f   :  { %v2573_v40 = vpop.eup %2572 }
0x1690   :  { %v1410_v42 = vmul.f32 %v2573_v40, %v1317_v12 }
0x16a8   :  { %v1044_v35 = vpop.permute.xlu0 %1043 }
0x16a9   :  { %2126 = vst.msk [vmem:[%s3256_s6 + $0x38] sm:$0xff] %vm67_vm1, %v1044_v35  ;;  %1048 = vst.msk [vmem:[#allocation6] sm:$0xff] %vm67_vm1, %v1044_v35  ;;  %v1195_v35 = vadd.f32 %v3073_v59, %v3137_v56 }
0x16b0   :  { %v1072_v36 = vld [vmem:[%s3256_s6 + $0x38] sm:$0xff] }
0x16b1   :  { %2396 = vmatmul.mubr.msk.f32.gmra.mxu0 %vm67_vm1, %v1072_v36 }
0x16b2   :  { %2428 = vmatprep.mubr.msk.f32.mxu0 %vm2694_vm0, %v2693_v0 }
0x16f0   :  { %v1413_v41 = vpop.permute.xlu1 %1412 }
0x16f1   :  { %v1415_v1 = vmul.f32 %v2573_v40, %v1413_v41 }
0x16f3   :  { %1417 = vrot.lane.b32.xlu1 %v1415_v1, %s2696_s10 }
0x1765   :  { %v1418_v47 = vpop.permute.xlu1 %1417 }
0x1766   :  { %v1420_v48 = vadd.f32 %v1418_v47, %v1410_v42 }
0x1768   :  { %2574 = vtanh.f32 %v1420_v48 }
0x1771   :  { %v3139_v57 = vpop.f32.mrf.mxu0 }
0x1773   :  { %v3141_v58 = vpop.f32.mrf.mxu0 }
0x1775   :  { %v2575_v49 = vpop.eup %2574 }
0x1776   :  { %1423 = vrot.lane.b32.xlu1 %v2575_v49, %s2695_s27 }
0x17e8   :  { %v1424_v50 = vpop.permute.xlu1 %1423 }
0x17e9   :  { %v1426_v51 = vmul.f32 %v2573_v40, %v1424_v50 }
0x17eb   :  { %1428 = vrot.lane.b32.xlu1 %v1426_v51, %s2696_s10 }
0x185d   :  { %v1429_v52 = vpop.permute.xlu1 %1428 }
0x185e   :  { %2147 = vst.msk [vmem:[%s3256_s6 + $0x8] sm:$0xff] %vm67_vm1, %v1429_v52  ;;  %2429 = vmatmul.mubr.msk.f32.vlgmr.msra.gmra.mxu0 %vm67_vm1, %v1429_v52 }
0x185f   :  { %2443 = vmatpush3.msra.mxu0 %v3012_v43  ;;  %2450 = vmatprep.mubr.msk.f32.mxu0 %vm2694_vm0, %v2693_v0 }
0x1860   :  { %2444 = vmatprep.subr.mxu0 %v2693_v0 }
0x1861   :  { %2445 = vmatpush3.msra.mxu0 %v3015_v44 }
0x1862   :  { %2446 = vmatprep.subr.mxu0 %v2693_v0 }
0x1863   :  { %2447 = vmatpush3.msra.mxu0 %v3019_v45 }
0x1864   :  { %2448 = vmatprep.subr.mxu0 %v2693_v0 }
0x1865   :  { %2449 = vmatpush3.msra.mxu0 %v3023_v46 }
0x1866   :  { %2464 = vmatprep.subr.mxu0 %v2693_v0 }
0x191e   :  { %v1501_v3 = vpop.f32.mrf.mxu0 }
0x191f   :  { %v1505_v62 = vadd.f32 %v1501_v3, %v1185_v60  ;;  %v1200_v60 = vadd.f32 %v3135_v55, %v3073_v59 }
0x1920   :  { %v2430_v2 = vpop.f32.mrf.mxu0 }
0x1921   :  { %2576 = vtanh.f32 %v1505_v62  ;;  %v2149_v14 = vmul.f32 -1.442695, %v1505_v62 }
0x1923   :  { %2578 = vpow2.f32 %v2149_v14 }
0x192e   :  { %v2577_v5 = vpop.eup %2576 }
0x192f   :  { %1515 = vrot.lane.b32.xlu0 %v2577_v5, %s2695_s27 }
0x1930   :  { %v2579_v63 = vpop.eup %2578 }
0x1931   :  { %v1509_v6 = vadd.f32 1.0, %v2579_v63 }
0x1933   :  { %2580 = vrcp.f32 %v1509_v6 }
0x1940   :  { %v2581_v4 = vpop.eup %2580 }
0x1941   :  { %v1513_v10 = vmul.f32 %v2581_v4, %v1420_v48 }
0x19a1   :  { %v1516_v8 = vpop.permute.xlu0 %1515 }
0x19a2   :  { %v1518_v7 = vmul.f32 %v2581_v4, %v1516_v8 }
0x19a4   :  { %1520 = vrot.lane.b32.xlu1 %v1518_v7, %s2696_s10 }
0x1a16   :  { %v1521_v11 = vpop.permute.xlu1 %1520 }
0x1a17   :  { %v1523_v9 = vadd.f32 %v1521_v11, %v1513_v10  ;;  %v1205_v11 = vadd.f32 %v3073_v59, %v3141_v58 }
0x1a19   :  { %2582 = vtanh.f32 %v1523_v9 }
0x1a26   :  { %v2583_v12 = vpop.eup %2582 }
0x1a27   :  { %1526 = vrot.lane.b32.xlu0 %v2583_v12, %s2695_s27 }
0x1a99   :  { %v1527_v13 = vpop.permute.xlu0 %1526 }
0x1a9a   :  { %v1529_v61 = vmul.f32 %v2581_v4, %v1527_v13 }
0x1a9c   :  { %1531 = vrot.lane.b32.xlu1 %v1529_v61, %s2696_s10 }
0x1b0e   :  { %v1532_v15 = vpop.permute.xlu1 %1531 }
0x1b0f   :  { %2150 = vst.msk [vmem:[%s3256_s6 + $0x10] sm:$0xff] %vm67_vm1, %v1532_v15  ;;  %2440 = vmatmul.mubr.msk.f32.vlgmr.msra.gmra.mxu1 %vm67_vm1, %v1532_v15 }
0x1b10   :  { %2454 = vmatpush3.msra.mxu1 %v3012_v43  ;;  %2461 = vmatprep.mubr.msk.f32.mxu1 %vm2694_vm0, %v2693_v0 }
0x1b11   :  { %2455 = vmatprep.subr.mxu1 %v2693_v0 }
0x1b12   :  { %2456 = vmatpush3.msra.mxu1 %v3015_v44 }
0x1b13   :  { %2457 = vmatprep.subr.mxu1 %v2693_v0 }
0x1b14   :  { %2458 = vmatpush3.msra.mxu1 %v3019_v45 }
0x1b15   :  { %2459 = vmatprep.subr.mxu1 %v2693_v0 }
0x1b16   :  { %2460 = vmatpush3.msra.mxu1 %v3023_v46 }
0x1b17   :  { %2475 = vmatprep.subr.mxu1 %v2693_v0 }
0x1bcf   :  { %v1604_v17 = vpop.f32.mrf.mxu1 }
0x1bd0   :  { %v1608_v18 = vadd.f32 %v1604_v17, %v1190_v16 }
0x1bd1   :  { %v2441_v19 = vpop.f32.mrf.mxu1 }
0x1bd2   :  { %2584 = vtanh.f32 %v1608_v18  ;;  %v2152_v21 = vmul.f32 -1.442695, %v1608_v18 }
0x1bd4   :  { %2586 = vpow2.f32 %v2152_v21 }
0x1bdf   :  { %v2585_v20 = vpop.eup %2584 }
0x1be0   :  { %1618 = vrot.lane.b32.xlu0 %v2585_v20, %s2695_s27 }
0x1be1   :  { %v2587_v22 = vpop.eup %2586 }
0x1be2   :  { %v1612_v23 = vadd.f32 1.0, %v2587_v22 }
0x1be4   :  { %2588 = vrcp.f32 %v1612_v23 }
0x1bf1   :  { %v2589_v24 = vpop.eup %2588 }
0x1bf2   :  { %v1616_v28 = vmul.f32 %v2589_v24, %v1523_v9 }
0x1c52   :  { %v1619_v25 = vpop.permute.xlu0 %1618 }
0x1c53   :  { %v1621_v27 = vmul.f32 %v2589_v24, %v1619_v25 }
0x1c55   :  { %1623 = vrot.lane.b32.xlu1 %v1621_v27, %s2696_s10 }
0x1cc7   :  { %v1624_v29 = vpop.permute.xlu1 %1623 }
0x1cc8   :  { %v1626_v30 = vadd.f32 %v1624_v29, %v1616_v28  ;;  %v1210_v28 = vadd.f32 %v3139_v57, %v3073_v59 }
0x1cca   :  { %2590 = vtanh.f32 %v1626_v30 }
0x1cd7   :  { %v2591_v31 = vpop.eup %2590 }
0x1cd8   :  { %1629 = vrot.lane.b32.xlu0 %v2591_v31, %s2695_s27 }
0x1d4a   :  { %v1630_v32 = vpop.permute.xlu0 %1629 }
0x1d4b   :  { %v1632_v33 = vmul.f32 %v2589_v24, %v1630_v32 }
0x1d4d   :  { %1634 = vrot.lane.b32.xlu1 %v1632_v33, %s2696_s10 }
0x1dbf   :  { %v1635_v34 = vpop.permute.xlu1 %1634 }
0x1dc0   :  { %2153 = vst.msk [vmem:[%s3256_s6 + $0x18] sm:$0xff] %vm67_vm1, %v1635_v34  ;;  %2451 = vmatmul.mubr.msk.f32.vlgmr.msra.gmra.mxu0 %vm67_vm1, %v1635_v34 }
0x1dc1   :  { %2465 = vmatpush3.msra.mxu0 %v3012_v43  ;;  %2472 = vmatprep.mubr.msk.f32.mxu0 %vm2694_vm0, %v2693_v0 }
0x1dc2   :  { %2466 = vmatprep.subr.mxu0 %v2693_v0 }
0x1dc3   :  { %2467 = vmatpush3.msra.mxu0 %v3015_v44 }
0x1dc4   :  { %2468 = vmatprep.subr.mxu0 %v2693_v0 }
0x1dc5   :  { %2469 = vmatpush3.msra.mxu0 %v3019_v45 }
0x1dc6   :  { %2470 = vmatprep.subr.mxu0 %v2693_v0 }
0x1dc7   :  { %2471 = vmatpush3.msra.mxu0 %v3023_v46 }
0x1e80   :  { %v1707_v36 = vpop.f32.mrf.mxu0 }
0x1e81   :  { %v1711_v37 = vadd.f32 %v1707_v36, %v1195_v35 }
0x1e82   :  { %v2452_v38 = vpop.f32.mrf.mxu0 }
0x1e83   :  { %2592 = vtanh.f32 %v1711_v37  ;;  %v2155_v40 = vmul.f32 -1.442695, %v1711_v37 }
0x1e85   :  { %2594 = vpow2.f32 %v2155_v40 }
0x1e90   :  { %v2593_v39 = vpop.eup %2592 }
0x1e91   :  { %1721 = vrot.lane.b32.xlu0 %v2593_v39, %s2695_s27 }
0x1e92   :  { %v2595_v41 = vpop.eup %2594 }
0x1e93   :  { %v1715_v1 = vadd.f32 1.0, %v2595_v41 }
0x1e95   :  { %2596 = vrcp.f32 %v1715_v1 }
0x1ea2   :  { %v2597_v42 = vpop.eup %2596 }
0x1ea3   :  { %v1719_v49 = vmul.f32 %v2597_v42, %v1626_v30 }
0x1f03   :  { %v1722_v47 = vpop.permute.xlu0 %1721 }
0x1f04   :  { %v1724_v48 = vmul.f32 %v2597_v42, %v1722_v47 }
0x1f06   :  { %1726 = vrot.lane.b32.xlu1 %v1724_v48, %s2696_s10 }
0x1f78   :  { %v1727_v50 = vpop.permute.xlu1 %1726 }
0x1f79   :  { %v1729_v51 = vadd.f32 %v1727_v50, %v1719_v49 }
0x1f7b   :  { %2598 = vtanh.f32 %v1729_v51 }
0x1f88   :  { %v2599_v52 = vpop.eup %2598 }
0x1f89   :  { %1732 = vrot.lane.b32.xlu0 %v2599_v52, %s2695_s27 }
0x1ffb   :  { %v1733_v53 = vpop.permute.xlu0 %1732 }
0x1ffc   :  { %v1735_v54 = vmul.f32 %v2597_v42, %v1733_v53 }
0x1ffe   :  { %1737 = vrot.lane.b32.xlu1 %v1735_v54, %s2696_s10 }
0x2070   :  { %v1738_v56 = vpop.permute.xlu1 %1737 }
0x2071   :  { %2156 = vst.msk [vmem:[%s3256_s6 + $0x20] sm:$0xff] %vm67_vm1, %v1738_v56  ;;  %2462 = vmatmul.mubr.msk.f32.vlgmr.msra.gmra.mxu1 %vm67_vm1, %v1738_v56 }
0x2072   :  { %2476 = vmatpush3.msra.mxu1 %v3012_v43  ;;  %2483 = vmatprep.mubr.msk.f32.mxu1 %vm2694_vm0, %v2693_v0 }
0x2073   :  { %2477 = vmatprep.subr.mxu1 %v2693_v0 }
0x2074   :  { %2478 = vmatpush3.msra.mxu1 %v3015_v44 }
0x2075   :  { %2479 = vmatprep.subr.mxu1 %v2693_v0 }
0x2076   :  { %2480 = vmatpush3.msra.mxu1 %v3019_v45 }
0x2077   :  { %2481 = vmatprep.subr.mxu1 %v2693_v0 }
0x2078   :  { %2482 = vmatpush3.msra.mxu1 %v3023_v46 }
0x2131   :  { %v1810_v3 = vpop.f32.mrf.mxu1 }
0x2132   :  { %v1814_v43 = vadd.f32 %v1810_v3, %v1200_v60 }
0x2133   :  { %v2463_v62 = vpop.f32.mrf.mxu1 }
0x2134   :  { %2600 = vtanh.f32 %v1814_v43  ;;  %v2158_v5 = vmul.f32 -1.442695, %v1814_v43 }
0x2136   :  { %2602 = vpow2.f32 %v2158_v5 }
0x2141   :  { %v2601_v2 = vpop.eup %2600 }
0x2142   :  { %1824 = vrot.lane.b32.xlu0 %v2601_v2, %s2695_s27 }
0x2143   :  { %v2603_v44 = vpop.eup %2602 }
0x2144   :  { %v1818_v14 = vadd.f32 1.0, %v2603_v44 }
0x2146   :  { %2604 = vrcp.f32 %v1818_v14 }
0x2153   :  { %v2605_v45 = vpop.eup %2604 }
0x2154   :  { %v1822_v46 = vmul.f32 %v2605_v45, %v1729_v51 }
0x21b4   :  { %v1825_v63 = vpop.permute.xlu0 %1824 }
0x21b5   :  { %v1827_v0 = vmul.f32 %v2605_v45, %v1825_v63 }
0x21b7   :  { %1829 = vrot.lane.b32.xlu1 %v1827_v0, %s2696_s10 }
0x2229   :  { %v1830_v6 = vpop.permute.xlu1 %1829 }
0x222a   :  { %v1832_v55 = vadd.f32 %v1830_v6, %v1822_v46 }
0x222c   :  { %2606 = vtanh.f32 %v1832_v55 }
0x2239   :  { %v2607_v4 = vpop.eup %2606 }
0x223a   :  { %1835 = vrot.lane.b32.xlu0 %v2607_v4, %s2695_s27 }
0x22ac   :  { %v1836_v8 = vpop.permute.xlu0 %1835 }
0x22ad   :  { %v1838_v7 = vmul.f32 %v2605_v45, %v1836_v8 }
0x22af   :  { %1840 = vrot.lane.b32.xlu1 %v1838_v7, %s2696_s10 }
0x2321   :  { %v1841_v10 = vpop.permute.xlu1 %1840 }
0x2322   :  { %2159 = vst.msk [vmem:[%s3256_s6 + $0x28] sm:$0xff] %vm67_vm1, %v1841_v10  ;;  %2473 = vmatmul.mubr.msk.f32.vlgmr.msra.gmra.mxu0 %vm67_vm1, %v1841_v10 }
0x23e2   :  { %v1913_v9 = vpop.f32.mrf.mxu0 }
0x23e3   :  { %v1917_v12 = vadd.f32 %v1913_v9, %v1205_v11 }
0x23e4   :  { %v2474_v13 = vpop.f32.mrf.mxu0 }
0x23e5   :  { %2608 = vtanh.f32 %v1917_v12  ;;  %v2161_v15 = vmul.f32 -1.442695, %v1917_v12 }
0x23e7   :  { %2610 = vpow2.f32 %v2161_v15 }
0x23f2   :  { %v2609_v61 = vpop.eup %2608 }
0x23f3   :  { %1927 = vrot.lane.b32.xlu0 %v2609_v61, %s2695_s27 }
0x23f4   :  { %v2611_v16 = vpop.eup %2610 }
0x23f5   :  { %v1921_v17 = vadd.f32 1.0, %v2611_v16 }
0x23f7   :  { %2612 = vrcp.f32 %v1921_v17 }
0x2404   :  { %v2613_v18 = vpop.eup %2612 }
0x2405   :  { %v1925_v21 = vmul.f32 %v2613_v18, %v1832_v55 }
0x2465   :  { %v1928_v19 = vpop.permute.xlu0 %1927 }
0x2466   :  { %v1930_v20 = vmul.f32 %v2613_v18, %v1928_v19 }
0x2468   :  { %1932 = vrot.lane.b32.xlu1 %v1930_v20, %s2696_s10 }
0x24da   :  { %v1933_v22 = vpop.permute.xlu1 %1932 }
0x24db   :  { %v1935_v58 = vadd.f32 %v1933_v22, %v1925_v21 }
0x24dd   :  { %2614 = vtanh.f32 %v1935_v58 }
0x24ea   :  { %v2615_v23 = vpop.eup %2614 }
0x24eb   :  { %1938 = vrot.lane.b32.xlu0 %v2615_v23, %s2695_s27 }
0x255d   :  { %v1939_v24 = vpop.permute.xlu0 %1938 }
0x255e   :  { %v1941_v25 = vmul.f32 %v2613_v18, %v1939_v24 }
0x2560   :  { %1943 = vrot.lane.b32.xlu1 %v1941_v25, %s2696_s10 }
0x25d2   :  { %v1944_v27 = vpop.permute.xlu1 %1943 }
0x25d3   :  { %2162 = vst.msk [vmem:[%s3256_s6 + $0x30] sm:$0xff] %vm67_vm1, %v1944_v27  ;;  %2484 = vmatmul.mubr.msk.f32.vlgmr.msra.gmra.mxu1 %vm67_vm1, %v1944_v27 }
0x2693   :  { %v2016_v29 = vpop.f32.mrf.mxu1 }
0x2694   :  { %v2020_v30 = vadd.f32 %v2016_v29, %v1210_v28 }
0x2695   :  { %v2485_v31 = vpop.f32.mrf.mxu1 }
0x2696   :  { %2616 = vtanh.f32 %v2020_v30  ;;  %v2164_v33 = vmul.f32 -1.442695, %v2020_v30 }
0x2698   :  { %2618 = vpow2.f32 %v2164_v33 }
0x26a3   :  { %v2617_v32 = vpop.eup %2616 }
0x26a4   :  { %2030 = vrot.lane.b32.xlu0 %v2617_v32, %s2695_s27 }
0x26a5   :  { %v2619_v34 = vpop.eup %2618 }
0x26a6   :  { %v2024_v35 = vadd.f32 1.0, %v2619_v34 }
0x26a8   :  { %2620 = vrcp.f32 %v2024_v35 }
0x26b5   :  { %v2621_v36 = vpop.eup %2620 }
0x26b6   :  { %v2028_v59 = vmul.f32 %v2621_v36, %v1935_v58 }
0x2716   :  { %v2031_v37 = vpop.permute.xlu0 %2030 }
0x2717   :  { %v2033_v38 = vmul.f32 %v2621_v36, %v2031_v37 }
0x2719   :  { %2035 = vrot.lane.b32.xlu1 %v2033_v38, %s2696_s10 }
0x271d   :  { %1050 = vrot.lane.b32.xlu1 %v3093_v26, %s2697_s5 }
0x278b   :  { %v2036_v57 = vpop.permute.xlu1 %2035 }
0x278c   :  { %v2038_v39 = vadd.f32 %v2036_v57, %v2028_v59 }
0x278e   :  { %2622 = vtanh.f32 %v2038_v39  ;;  %2053 = vrot.lane.b32.xlu1 %v2038_v39, %s2697_s5 }
0x278f   :  { %v1051_v40 = vpop.permute.xlu1 %1050 }
0x2790   :  { %1053 = vst.msk [vmem:[#allocation7] sm:$0xff] %vm67_vm1, %v1051_v40 }
0x279b   :  { %v2623_v41 = vpop.eup %2622 }
0x279c   :  { %2041 = vrot.lane.b32.xlu0 %v2623_v41, %s2695_s27 }
0x2800   :  { %v2054_v1 = vpop.permute.xlu1 %2053 }
0x2801   :  { %2057 = vst.msk [vmem:[#allocation7 + $0x8] sm:$0xff] %vm67_vm1, %v2054_v1 }
0x2802   :  { %2655 = shalt.err (!%p2652_p9)
}
0x2803   :  { %2083 = dma.vmem_to_hbm [thread:$0]  %s2078_s18, 256, %s3258_s8, [#allocation8], %s2691_s30, %s2691_s30, %s2692_s9  }
0x2804   :  { %s2699_s27 = smov [#allocation6]  }
0x2805   :  { %s2065_s3 = sshll.u32 %s2699_s27, 4  ;;  %s2066_s3 = int_to_ptr.vmem [resolvable:$true] %s2065_s3 }
0x2806   :  { %s2664_s23 = scalar_lea.vmem %s2066_s3, 256  ;;  %p2669_p11 = scmp.lt.s32.totalorder %s2066_s3, %s2066_s3 }
0x2807   :  { %p2665_p10 = scmp.ne.s32.totalorder %s2066_s3, %s2664_s23  ;;  %p2670_p12 = scmp.lt.s32.totalorder %s2664_s23, %s2664_s23 }
0x2809   :  { %p2671_p13 = por %p2670_p12, %p2669_p11 }
0x280b   :  { %p2672_p0 = pnand %p2671_p13, %p2665_p10 }
0x280e   :  { %v2042_v26 = vpop.permute.xlu0 %2041 }
0x280f   :  { %v2044_v42 = vmul.f32 %v2621_v36, %v2042_v26 }
0x2811   :  { %2046 = vrot.lane.b32.xlu0 %v2044_v42, %s2696_s10 }
0x2883   :  { %v2047_v47 = vpop.permute.xlu0 %2046 }
0x2884   :  { %2165 = vst.msk [vmem:[%s3256_s6 + $0x38] sm:$0xff] %vm67_vm1, %v2047_v47  ;;  %2051 = vst.msk [vmem:[#allocation6 + $0x8] sm:$0xff] %vm67_vm1, %v2047_v47 }
0x2885   :  { %2675 = shalt.err (!%p2672_p0)
}
0x2886   :  { %2071 = dma.vmem_to_hbm [thread:$0]  %s2066_s3, 256, %s3257_s7, [#allocation5], %s2691_s30, %s2691_s30, %s2692_s9  }
0x2887   :  { %2686 = dma.done.wait [#allocation5], 256  }
0x2888   :  { %2687 = vsyncadd [#allocation5], 4294967040 }
0x2889   :  { %2688 = dma.done.wait [#allocation8], 256  }
0x288a   :  { %2689 = vsyncadd [#allocation8], 4294967040 }
0x288b   :  { %2092 = vsyncpa [#allocation4], 1 }
0x288c   :  { %2093 = vsyncpa [#allocation5], 1 }
0x288d   :  { %2094 = vsyncpa [#allocation8], 1 }

</bundles_post_ra>
